<compile_context>
chip_gen: v5e
topology: v5e:2x2
jax: 0.10.0
libtpu: 0.0.40
codegen_flags: <defaults>
</compile_context>

<pallas_src>
import functools

import jax
import jax.numpy as jnp
from jax.experimental import pallas as pl
from jax.experimental.pallas import tpu as pltpu

# ----------------------------- small synthetic config -----------------------------
B = 2
C_IN = 4
H = W = 16
C = 32              # backbone feature channels == MixVPR in_channels
HW = H * W          # 256 == in_h * in_w
MIX_DEPTH = 2       # number of FeatureMixerLayer blocks
MLP_RATIO = 1
HID = HW * MLP_RATIO
OUT_C = 16          # MixVPR out_channels
OUT_ROWS = 4        # MixVPR out_rows
OUT_DIM = OUT_C * OUT_ROWS
LN_EPS = 1e-5       # nn.LayerNorm default eps
L2_EPS = 1e-12      # F.normalize default eps


# ----------------------------- fused stem + MixVPR kernel -----------------------------
def vpr_fused_kernel(cols_ref, wconv_ref, bconv_ref,
                     lnw_ref, lnb_ref, w1t_ref, b1_ref, w2t_ref, b2_ref,
                     wrt_ref, wc_cols_ref, eye_tile_ref, bflat_ref,
                     o_ref, x_ref, *, block_batch):
    """grid = (batch_block i, mixer depth d); d is the inner 'arbitrary' axis.

    d == 0            : stem conv (+ReLU) -> residual stream x_ref (VMEM scratch)
    every d           : one FeatureMixerLayer (that layer's weights stream per step)
    d == MIX_DEPTH-1  : channel_proj/row_proj epilogue + L2 norm -> lane-dense output
    """
    d = pl.program_id(1)

    # ---- backbone stem: batched 3x3 conv as one (C,36)x(36,bb*HW) matmul + ReLU ----
    @pl.when(d == 0)
    def _():
        feat = jnp.dot(wconv_ref[...], cols_ref[...],
                       preferred_element_type=jnp.float32)              # (C, bb*HW) f32
        feat = jnp.maximum(feat + bconv_ref[...], 0.0)
        # slice-stack the per-image (C, HW) halves into the (bb*C, HW) residual stream
        for b in range(block_batch):
            x_ref[b * C:(b + 1) * C, :] = feat[:, b * HW:(b + 1) * HW]

    # ---- FeatureMixerLayer d: x = x + Linear2(ReLU(Linear1(LN(x)))) ----
    x = x_ref[...]                                                       # (bb*C, HW) f32
    mu = jnp.mean(x, axis=-1, keepdims=True)
    xc = x - mu
    var = jnp.mean(xc * xc, axis=-1, keepdims=True)                      # two-pass variance (torch parity)
    ln = xc * jax.lax.rsqrt(var + LN_EPS) * lnw_ref[0] + lnb_ref[0]
    # bf16 matmul operands, f32 accumulation
    h = jnp.dot(ln.astype(jnp.bfloat16), w1t_ref[0],
                preferred_element_type=jnp.float32) + b1_ref[0]
    h = jnp.maximum(h, 0.0)
    y = jnp.dot(h.astype(jnp.bfloat16), w2t_ref[0],
                preferred_element_type=jnp.float32) + b2_ref[0]
    x_new = x + y
    x_ref[...] = x_new

    # ---- epilogue: swapped projection order + lane-dense flatten + L2 normalize ----
    @pl.when(d == pl.num_programs(1) - 1)
    def _():
        # q = x @ wrt first (one batched MXU dot), then channel_proj fused with the
        # (OUT_C, OUT_ROWS) -> OUT_DIM flatten:
        #   g[c, j]  = q[c, j % OUT_ROWS]                (tiny K=4 MXU dot with identity tile)
        #   zf[0, j] = sum_c wc[j//OUT_ROWS, c] * g[c, j] + bias_flat[j]
        # so the descriptor is produced directly in flattened lane order; no in-kernel
        # (16,4)->(1,64) reshape and no 68 KB wr_big/sel operands.
        q_all = jnp.dot(x_new, wrt_ref[...],
                        preferred_element_type=jnp.float32)              # (bb*C, OUT_ROWS)
        rows = []
        for b in range(block_batch):
            qb = q_all[b * C:(b + 1) * C]                                # (C, OUT_ROWS)
            g = jnp.dot(qb, eye_tile_ref[...],
                        preferred_element_type=jnp.float32)              # (C, OUT_DIM)
            zf = (jnp.sum(wc_cols_ref[...] * g, axis=0, keepdims=True)
                  + bflat_ref[...])                                      # (1, OUT_DIM)
            # F.normalize(flatten, p=2, dim=-1): x * rsqrt(max(||x||^2, eps^2))
            ss = jnp.sum(zf * zf)
            rows.append(zf * jax.lax.rsqrt(jnp.maximum(ss, L2_EPS * L2_EPS)))
        row = rows[0] if block_batch == 1 else jnp.concatenate(rows, axis=-1)
        o_ref[0] = row                                                   # single lane-dense store


def _pick_block_batch():
    """v7x has 2 TensorCores/chip: fold B/2 images per core so the parallel grid axis
    shards across both cores while keeping MXU M as large as possible.  Single-TC
    chips (v5e/v6e): fold the whole batch (one batch-block, weights touched once per
    depth step, mixer LHS M = B*C).  If B grows, keep folding until bb*C ~ 256."""
    try:
        kind = jax.devices()[0].device_kind.lower()
    except Exception:
        kind = ""
    return max(1, B // 2) if "v7" in kind else B


@functools.partial(jax.jit, static_argnames=("block_batch",))
def vpr_forward(x, conv_w, conv_b, params, *, block_batch):
    assert B % block_batch == 0
    bb = block_batch

    # TODO(synk): the pretrained ResNet50 backbone (helper.get_backbone) is represented by a
    # single 3x3 conv + ReLU stem (no checkpoint loading); im2col below is host-side glue.
    xp = jnp.pad(x, ((0, 0), (0, 0), (1, 1), (1, 1)))
    taps = [xp[:, :, dy:dy + H, dx:dx + W] for dy in range(3) for dx in range(3)]
    cols = jnp.concatenate(taps, axis=1).reshape(B, 9 * C_IN, HW)              # (B, 36, HW)
    # batched-stem layout: (9*C_IN, B*HW), image-major along lanes; bf16 operands
    cols_wide = jnp.transpose(cols, (1, 0, 2)).reshape(9 * C_IN, B * HW).astype(jnp.bfloat16)
    wmat = jnp.transpose(conv_w, (0, 2, 3, 1)).reshape(C, 9 * C_IN).astype(jnp.bfloat16)
    bcol = conv_b.reshape(C, 1)

    # Epilogue packing (host-side, once):  z = wc @ (x @ wrt) + bc * colsum(wrt) + br
    #   wc_cols[c, j]  = wc[j // OUT_ROWS, c]
    #   eye_tile[r, j] = (r == j % OUT_ROWS)
    #   bflat[0, j]    = bc[j//OUT_ROWS] * colsum(wrt)[j%OUT_ROWS] + br[j%OUT_ROWS]
    wrt = params["wrt"]                                                         # (HW, OUT_ROWS)
    wc_cols = jnp.transpose(jnp.repeat(params["wc"], OUT_ROWS, axis=0))         # (C, OUT_DIM)
    eye_tile = jnp.tile(jnp.eye(OUT_ROWS, dtype=jnp.float32), (1, OUT_C))       # (OUT_ROWS, OUT_DIM)
    bflat = (params["bc"] @ jnp.sum(wrt, axis=0, keepdims=True)
             + params["br"]).reshape(1, OUT_DIM)                                # (1, OUT_DIM)

    const2 = lambda i, d: (0, 0)
    perlayer3 = lambda i, d: (d, 0, 0)

    out3 = pl.pallas_call(
        functools.partial(vpr_fused_kernel, block_batch=bb),
        out_shape=jax.ShapeDtypeStruct((B // bb, 1, bb * OUT_DIM), jnp.float32),
        grid=(B // bb, MIX_DEPTH),
        in_specs=[
            pl.BlockSpec((9 * C_IN, bb * HW), lambda i, d: (0, i)),  # im2col patches (bf16)
            pl.BlockSpec((C, 9 * C_IN), const2),                     # conv weight (bf16)
            pl.BlockSpec((C, 1), const2),                            # conv bias
            pl.BlockSpec((1, 1, HW), perlayer3),                     # LayerNorm weight[d]
            pl.BlockSpec((1, 1, HW), perlayer3),                     # LayerNorm bias[d]
            pl.BlockSpec((1, HW, HID), perlayer3),                   # mixer Linear1^T[d] (bf16)
            pl.BlockSpec((1, 1, HID), perlayer3),                    # mixer bias1[d]
            pl.BlockSpec((1, HID, HW), perlayer3),                   # mixer Linear2^T[d] (bf16)
            pl.BlockSpec((1, 1, HW), perlayer3),                     # mixer bias2[d]
            pl.BlockSpec((HW, OUT_ROWS), const2),                    # row_proj weight^T
            pl.BlockSpec((C, OUT_DIM), const2),                      # lane-replicated channel_proj
            pl.BlockSpec((OUT_ROWS, OUT_DIM), const2),               # identity tile for flatten
            pl.BlockSpec((1, OUT_DIM), const2),                      # fused flat bias
        ],
        out_specs=pl.BlockSpec((1, 1, bb * OUT_DIM), lambda i, d: (i, 0, 0)),
        scratch_shapes=[pltpu.VMEM((bb * C, HW), jnp.float32)],      # residual stream x
        compiler_params=pltpu.CompilerParams(
            dimension_semantics=("parallel", "arbitrary"),
            vmem_limit_bytes=32 * 1024 * 1024),
    )(cols_wide, wmat, bcol,
      params["ln_w"], params["ln_b"], params["w1t"], params["b1"],
      params["w2t"], params["b2"],
      wrt, wc_cols, eye_tile, bflat)

    # flatten(1) — pure layout glue (each grid block already holds bb lane-dense descriptors)
    return out3.reshape(B, OUT_DIM)


if __name__ == "__main__":
    key = jax.random.PRNGKey(0)
    ks = jax.random.split(key, 12)

    x = jax.random.normal(ks[0], (B, C_IN, H, W), jnp.float32)

    # Deterministic synthetic parameters (torch init would be random anyway).
    conv_w = jax.random.normal(ks[1], (C, C_IN, 3, 3), jnp.float32) * 0.1
    conv_b = jax.random.normal(ks[2], (C,), jnp.float32) * 0.01

    params = {
        "ln_w": jnp.ones((MIX_DEPTH, 1, HW), jnp.float32),     # nn.LayerNorm default
        "ln_b": jnp.zeros((MIX_DEPTH, 1, HW), jnp.float32),
        # large mixer weights stored in bf16 (matmul operands); accumulation stays f32.
        # NOTE: bf16 operands diverge from a pure-f32 torch reference by ~1e-2 relative.
        "w1t": (jax.random.normal(ks[3], (MIX_DEPTH, HW, HID), jnp.float32) * 0.05
                ).astype(jnp.bfloat16),
        "b1": jax.random.normal(ks[4], (MIX_DEPTH, 1, HID), jnp.float32) * 0.01,
        "w2t": (jax.random.normal(ks[5], (MIX_DEPTH, HID, HW), jnp.float32) * 0.05
                ).astype(jnp.bfloat16),
        "b2": jax.random.normal(ks[6], (MIX_DEPTH, 1, HW), jnp.float32) * 0.01,
        "wc": jax.random.normal(ks[7], (OUT_C, C), jnp.float32) * 0.05,
        "bc": jax.random.normal(ks[8], (OUT_C, 1), jnp.float32) * 0.01,
        "wrt": jax.random.normal(ks[9], (HW, OUT_ROWS), jnp.float32) * 0.05,
        "br": jax.random.normal(ks[10], (1, OUT_ROWS), jnp.float32) * 0.01,
    }

    bb = _pick_block_batch()
    out = vpr_forward(x, conv_w, conv_b, params, block_batch=bb)
    jax.block_until_ready(out)
    assert out.shape == (B, OUT_C * OUT_ROWS)
    assert bool(jnp.all(jnp.isfinite(out)))
    print("KERNEL_OK")
</pallas_src>

<mosaic_0001>
module attributes {stable_mosaic.version = 11 : i64} {
  func.func @vpr_fused_kernel(%arg0: i32, %arg1: i32, %arg2: memref<36x512xbf16, #tpu.memory_space<vmem>>, %arg3: memref<32x36xbf16, #tpu.memory_space<vmem>>, %arg4: memref<32x1xf32, #tpu.memory_space<vmem>>, %arg5: memref<1x1x256xf32, #tpu.memory_space<vmem>>, %arg6: memref<1x1x256xf32, #tpu.memory_space<vmem>>, %arg7: memref<1x256x256xbf16, #tpu.memory_space<vmem>>, %arg8: memref<1x1x256xf32, #tpu.memory_space<vmem>>, %arg9: memref<1x256x256xbf16, #tpu.memory_space<vmem>>, %arg10: memref<1x1x256xf32, #tpu.memory_space<vmem>>, %arg11: memref<256x4xf32, #tpu.memory_space<vmem>>, %arg12: memref<32x64xf32, #tpu.memory_space<vmem>>, %arg13: memref<4x64xf32, #tpu.memory_space<vmem>>, %arg14: memref<1x64xf32, #tpu.memory_space<vmem>>, %arg15: memref<1x1x128xf32, #tpu.memory_space<vmem>>, %arg16: memref<64x256xf32, #tpu.memory_space<vmem>>) attributes {dimension_semantics = [#tpu.dimension_semantics<parallel>, #tpu.dimension_semantics<arbitrary>], iteration_bounds = array<i64: 1, 2>, scalar_prefetch = 0 : i64, scratch_operands = 1 : i64, tpu.core_type = #tpu.core_type<tc>, window_params = [{transform_indices = @transform_0, window_bounds = array<i64: 36, 512>}, {pipeline_mode = #tpu.pipeline_mode<synchronous>, transform_indices = @transform_1, window_bounds = array<i64: 32, 36>}, {pipeline_mode = #tpu.pipeline_mode<synchronous>, transform_indices = @transform_2, window_bounds = array<i64: 32, 1>}, {transform_indices = @transform_3, window_bounds = array<i64: 1, 1, 256>}, {transform_indices = @transform_4, window_bounds = array<i64: 1, 1, 256>}, {transform_indices = @transform_5, window_bounds = array<i64: 1, 256, 256>}, {transform_indices = @transform_6, window_bounds = array<i64: 1, 1, 256>}, {transform_indices = @transform_7, window_bounds = array<i64: 1, 256, 256>}, {transform_indices = @transform_8, window_bounds = array<i64: 1, 1, 256>}, {pipeline_mode = #tpu.pipeline_mode<synchronous>, transform_indices = @transform_9, window_bounds = array<i64: 256, 4>}, {pipeline_mode = #tpu.pipeline_mode<synchronous>, transform_indices = @transform_10, window_bounds = array<i64: 32, 64>}, {pipeline_mode = #tpu.pipeline_mode<synchronous>, transform_indices = @transform_11, window_bounds = array<i64: 4, 64>}, {pipeline_mode = #tpu.pipeline_mode<synchronous>, transform_indices = @transform_12, window_bounds = array<i64: 1, 64>}, {transform_indices = @transform_13, window_bounds = array<i64: 1, 1, 128>}]} {
    %c0_i32 = arith.constant 0 : i32
    %0 = arith.cmpi eq, %arg1, %c0_i32 : i32
    %1 = arith.extui %0 : i1 to i32
    %c0_i32_0 = arith.constant 0 : i32
    %2 = arith.cmpi ne, %1, %c0_i32_0 : i32
    scf.if %2 {
      %c0_30 = arith.constant 0 : index
      %c0_31 = arith.constant 0 : index
      %51 = vector.load %arg3[%c0_30, %c0_31] : memref<32x36xbf16, #tpu.memory_space<vmem>>, vector<32x36xbf16>
      %c0_32 = arith.constant 0 : index
      %c0_33 = arith.constant 0 : index
      %52 = vector.load %arg2[%c0_32, %c0_33] : memref<36x512xbf16, #tpu.memory_space<vmem>>, vector<36x512xbf16>
      %cst_34 = arith.constant dense<0.000000e+00> : vector<32x512xf32>
      %53 = tpu.matmul %51, %52, %cst_34 {dimension_numbers = #tpu.dot_dimension_numbers<[1], [0], [0], [1], [0, 0, 1, 1], [], []>} : vector<32x36xbf16>, vector<36x512xbf16>, vector<32x512xf32> -> vector<32x512xf32>
      %c0_35 = arith.constant 0 : index
      %c0_36 = arith.constant 0 : index
      %54 = vector.load %arg4[%c0_35, %c0_36] : memref<32x1xf32, #tpu.memory_space<vmem>>, vector<32x1xf32>
      %55 = vector.broadcast %54 : vector<32x1xf32> to vector<32x512xf32>
      %56 = arith.addf %53, %55 : vector<32x512xf32>
      %cst_37 = arith.constant 0.000000e+00 : f32
      %57 = vector.broadcast %cst_37 : f32 to vector<32x512xf32>
      %58 = arith.maximumf %56, %57 : vector<32x512xf32>
      %59 = vector.extract_strided_slice %58 {offsets = [0, 0], sizes = [32, 256], strides = [1, 1]} : vector<32x512xf32> to vector<32x256xf32>
      %c0_38 = arith.constant 0 : index
      %c0_39 = arith.constant 0 : index
      %60 = vector.load %arg16[%c0_38, %c0_39] : memref<64x256xf32, #tpu.memory_space<vmem>>, vector<32x256xf32>
      tpu.vector_store %arg16[%c0_38, %c0_39], %59 {strides = array<i32>} : memref<64x256xf32, #tpu.memory_space<vmem>>, vector<32x256xf32>,
      %61 = vector.extract_strided_slice %58 {offsets = [0, 256], sizes = [32, 256], strides = [1, 1]} : vector<32x512xf32> to vector<32x256xf32>
      %c32 = arith.constant 32 : index
      %c0_40 = arith.constant 0 : index
      %62 = vector.load %arg16[%c32, %c0_40] : memref<64x256xf32, #tpu.memory_space<vmem>>, vector<32x256xf32>
      tpu.vector_store %arg16[%c32, %c0_40], %61 {strides = array<i32>} : memref<64x256xf32, #tpu.memory_space<vmem>>, vector<32x256xf32>,
    } else {
    }
    %c0 = arith.constant 0 : index
    %c0_1 = arith.constant 0 : index
    %3 = vector.load %arg16[%c0, %c0_1] : memref<64x256xf32, #tpu.memory_space<vmem>>, vector<64x256xf32>
    %cst = arith.constant dense<0.000000e+00> : vector<64xf32>
    %4 = vector.multi_reduction <add>, %3, %cst [1] : vector<64x256xf32> to vector<64xf32>
    %5 = vector.shape_cast %4 : vector<64xf32> to vector<64x1xf32>
    %cst_2 = arith.constant 2.560000e+02 : f32
    %6 = vector.broadcast %cst_2 : f32 to vector<64x1xf32>
    %7 = arith.divf %5, %6 : vector<64x1xf32>
    %8 = vector.broadcast %7 : vector<64x1xf32> to vector<64x256xf32>
    %9 = arith.subf %3, %8 : vector<64x256xf32>
    %10 = arith.mulf %9, %9 : vector<64x256xf32>
    %cst_3 = arith.constant dense<0.000000e+00> : vector<64xf32>
    %11 = vector.multi_reduction <add>, %10, %cst_3 [1] : vector<64x256xf32> to vector<64xf32>
    %12 = vector.shape_cast %11 : vector<64xf32> to vector<64x1xf32>
    %cst_4 = arith.constant 2.560000e+02 : f32
    %13 = vector.broadcast %cst_4 : f32 to vector<64x1xf32>
    %14 = arith.divf %12, %13 : vector<64x1xf32>
    %cst_5 = arith.constant 9.99999974E-6 : f32
    %15 = vector.broadcast %cst_5 : f32 to vector<64x1xf32>
    %16 = arith.addf %14, %15 : vector<64x1xf32>
    %17 = math.rsqrt %16 : vector<64x1xf32>
    %18 = vector.broadcast %17 : vector<64x1xf32> to vector<64x256xf32>
    %19 = arith.mulf %9, %18 : vector<64x256xf32>
    %c0_6 = arith.constant 0 : index
    %c0_7 = arith.constant 0 : index
    %c0_8 = arith.constant 0 : index
    %20 = vector.load %arg5[%c0_6, %c0_7, %c0_8] : memref<1x1x256xf32, #tpu.memory_space<vmem>>, vector<1x1x256xf32>
    %21 = vector.shape_cast %20 : vector<1x1x256xf32> to vector<1x256xf32>
    %22 = vector.broadcast %21 : vector<1x256xf32> to vector<64x256xf32>
    %23 = arith.mulf %19, %22 : vector<64x256xf32>
    %c0_9 = arith.constant 0 : index
    %c0_10 = arith.constant 0 : index
    %c0_11 = arith.constant 0 : index
    %24 = vector.load %arg6[%c0_9, %c0_10, %c0_11] : memref<1x1x256xf32, #tpu.memory_space<vmem>>, vector<1x1x256xf32>
    %25 = vector.shape_cast %24 : vector<1x1x256xf32> to vector<1x256xf32>
    %26 = vector.broadcast %25 : vector<1x256xf32> to vector<64x256xf32>
    %27 = arith.addf %23, %26 : vector<64x256xf32>
    %28 = arith.truncf %27 : vector<64x256xf32> to vector<64x256xbf16>
    %c0_12 = arith.constant 0 : index
    %c0_13 = arith.constant 0 : index
    %c0_14 = arith.constant 0 : index
    %29 = vector.load %arg7[%c0_12, %c0_13, %c0_14] : memref<1x256x256xbf16, #tpu.memory_space<vmem>>, vector<1x256x256xbf16>
    %30 = vector.shape_cast %29 : vector<1x256x256xbf16> to vector<256x256xbf16>
    %cst_15 = arith.constant dense<0.000000e+00> : vector<64x256xf32>
    %31 = tpu.matmul %28, %30, %cst_15 {dimension_numbers = #tpu.dot_dimension_numbers<[1], [0], [0], [1], [0, 0, 1, 1], [], []>} : vector<64x256xbf16>, vector<256x256xbf16>, vector<64x256xf32> -> vector<64x256xf32>
    %c0_16 = arith.constant 0 : index
    %c0_17 = arith.constant 0 : index
    %c0_18 = arith.constant 0 : index
    %32 = vector.load %arg8[%c0_16, %c0_17, %c0_18] : memref<1x1x256xf32, #tpu.memory_space<vmem>>, vector<1x1x256xf32>
    %33 = vector.shape_cast %32 : vector<1x1x256xf32> to vector<1x256xf32>
    %34 = vector.broadcast %33 : vector<1x256xf32> to vector<64x256xf32>
    %35 = arith.addf %31, %34 : vector<64x256xf32>
    %cst_19 = arith.constant 0.000000e+00 : f32
    %36 = vector.broadcast %cst_19 : f32 to vector<64x256xf32>
    %37 = arith.maximumf %35, %36 : vector<64x256xf32>
    %38 = arith.truncf %37 : vector<64x256xf32> to vector<64x256xbf16>
    %c0_20 = arith.constant 0 : index
    %c0_21 = arith.constant 0 : index
    %c0_22 = arith.constant 0 : index
    %39 = vector.load %arg9[%c0_20, %c0_21, %c0_22] : memref<1x256x256xbf16, #tpu.memory_space<vmem>>, vector<1x256x256xbf16>
    %40 = vector.shape_cast %39 : vector<1x256x256xbf16> to vector<256x256xbf16>
    %cst_23 = arith.constant dense<0.000000e+00> : vector<64x256xf32>
    %41 = tpu.matmul %38, %40, %cst_23 {dimension_numbers = #tpu.dot_dimension_numbers<[1], [0], [0], [1], [0, 0, 1, 1], [], []>} : vector<64x256xbf16>, vector<256x256xbf16>, vector<64x256xf32> -> vector<64x256xf32>
    %c0_24 = arith.constant 0 : index
    %c0_25 = arith.constant 0 : index
    %c0_26 = arith.constant 0 : index
    %42 = vector.load %arg10[%c0_24, %c0_25, %c0_26] : memref<1x1x256xf32, #tpu.memory_space<vmem>>, vector<1x1x256xf32>
    %43 = vector.shape_cast %42 : vector<1x1x256xf32> to vector<1x256xf32>
    %44 = vector.broadcast %43 : vector<1x256xf32> to vector<64x256xf32>
    %45 = arith.addf %41, %44 : vector<64x256xf32>
    %46 = arith.addf %3, %45 : vector<64x256xf32>
    %c0_27 = arith.constant 0 : index
    %c0_28 = arith.constant 0 : index
    %47 = vector.load %arg16[%c0_27, %c0_28] : memref<64x256xf32, #tpu.memory_space<vmem>>, vector<64x256xf32>
    tpu.vector_store %arg16[%c0_27, %c0_28], %46 {strides = array<i32>} : memref<64x256xf32, #tpu.memory_space<vmem>>, vector<64x256xf32>,
    %c1_i32 = arith.constant 1 : i32
    %48 = arith.cmpi eq, %arg1, %c1_i32 : i32
    %49 = arith.extui %48 : i1 to i32
    %c0_i32_29 = arith.constant 0 : i32
    %50 = arith.cmpi ne, %49, %c0_i32_29 : i32
    scf.if %50 {
      %c0_30 = arith.constant 0 : index
      %c0_31 = arith.constant 0 : index
      %51 = vector.load %arg11[%c0_30, %c0_31] : memref<256x4xf32, #tpu.memory_space<vmem>>, vector<256x4xf32>
      %cst_32 = arith.constant dense<0.000000e+00> : vector<64x4xf32>
      %52 = tpu.matmul %46, %51, %cst_32 {dimension_numbers = #tpu.dot_dimension_numbers<[1], [0], [0], [1], [0, 0, 1, 1], [], []>} : vector<64x256xf32>, vector<256x4xf32>, vector<64x4xf32> -> vector<64x4xf32>
      %53 = vector.extract_strided_slice %52 {offsets = [0, 0], sizes = [32, 4], strides = [1, 1]} : vector<64x4xf32> to vector<32x4xf32>
      %c0_33 = arith.constant 0 : index
      %c0_34 = arith.constant 0 : index
      %54 = vector.load %arg13[%c0_33, %c0_34] : memref<4x64xf32, #tpu.memory_space<vmem>>, vector<4x64xf32>
      %cst_35 = arith.constant dense<0.000000e+00> : vector<32x64xf32>
      %55 = tpu.matmul %53, %54, %cst_35 {dimension_numbers = #tpu.dot_dimension_numbers<[1], [0], [0], [1], [0, 0, 1, 1], [], []>} : vector<32x4xf32>, vector<4x64xf32>, vector<32x64xf32> -> vector<32x64xf32>
      %c0_36 = arith.constant 0 : index
      %c0_37 = arith.constant 0 : index
      %56 = vector.load %arg12[%c0_36, %c0_37] : memref<32x64xf32, #tpu.memory_space<vmem>>, vector<32x64xf32>
      %57 = arith.mulf %56, %55 : vector<32x64xf32>
      %cst_38 = arith.constant dense<0.000000e+00> : vector<64xf32>
      %58 = vector.multi_reduction <add>, %57, %cst_38 [0] : vector<32x64xf32> to vector<64xf32>
      %59 = vector.shape_cast %58 : vector<64xf32> to vector<1x64xf32>
      %c0_39 = arith.constant 0 : index
      %c0_40 = arith.constant 0 : index
      %60 = vector.load %arg14[%c0_39, %c0_40] : memref<1x64xf32, #tpu.memory_space<vmem>>, vector<1x64xf32>
      %61 = arith.addf %59, %60 : vector<1x64xf32>
      %62 = arith.mulf %61, %61 : vector<1x64xf32>
      %63 = vector.shape_cast %62 : vector<1x64xf32> to vector<1x1x64xf32>
      %cst_41 = arith.constant dense<0.000000e+00> : vector<1xf32>
      %64 = vector.multi_reduction <add>, %63, %cst_41 [1, 2] : vector<1x1x64xf32> to vector<1xf32>
      %65 = vector.shape_cast %64 : vector<1xf32> to vector<1x1x1xf32>
      %66 = vector.extract %65[0, 0, 0] : f32 from vector<1x1x1xf32>
      %cst_42 = arith.constant 1.000000e-24 : f32
      %67 = arith.maximumf %66, %cst_42 : f32
      %68 = math.rsqrt %67 : f32
      %69 = vector.broadcast %68 : f32 to vector<1x64xf32>
      %70 = arith.mulf %61, %69 : vector<1x64xf32>
      %71 = vector.extract_strided_slice %52 {offsets = [32, 0], sizes = [32, 4], strides = [1, 1]} : vector<64x4xf32> to vector<32x4xf32>
      %c0_43 = arith.constant 0 : index
      %c0_44 = arith.constant 0 : index
      %72 = vector.load %arg13[%c0_43, %c0_44] : memref<4x64xf32, #tpu.memory_space<vmem>>, vector<4x64xf32>
      %cst_45 = arith.constant dense<0.000000e+00> : vector<32x64xf32>
      %73 = tpu.matmul %71, %72, %cst_45 {dimension_numbers = #tpu.dot_dimension_numbers<[1], [0], [0], [1], [0, 0, 1, 1], [], []>} : vector<32x4xf32>, vector<4x64xf32>, vector<32x64xf32> -> vector<32x64xf32>
      %c0_46 = arith.constant 0 : index
      %c0_47 = arith.constant 0 : index
      %74 = vector.load %arg12[%c0_46, %c0_47] : memref<32x64xf32, #tpu.memory_space<vmem>>, vector<32x64xf32>
      %75 = arith.mulf %74, %73 : vector<32x64xf32>
      %cst_48 = arith.constant dense<0.000000e+00> : vector<64xf32>
      %76 = vector.multi_reduction <add>, %75, %cst_48 [0] : vector<32x64xf32> to vector<64xf32>
      %77 = vector.shape_cast %76 : vector<64xf32> to vector<1x64xf32>
      %c0_49 = arith.constant 0 : index
      %c0_50 = arith.constant 0 : index
      %78 = vector.load %arg14[%c0_49, %c0_50] : memref<1x64xf32, #tpu.memory_space<vmem>>, vector<1x64xf32>
      %79 = arith.addf %77, %78 : vector<1x64xf32>
      %80 = arith.mulf %79, %79 : vector<1x64xf32>
      %81 = vector.shape_cast %80 : vector<1x64xf32> to vector<1x1x64xf32>
      %cst_51 = arith.constant dense<0.000000e+00> : vector<1xf32>
      %82 = vector.multi_reduction <add>, %81, %cst_51 [1, 2] : vector<1x1x64xf32> to vector<1xf32>
      %83 = vector.shape_cast %82 : vector<1xf32> to vector<1x1x1xf32>
      %84 = vector.extract %83[0, 0, 0] : f32 from vector<1x1x1xf32>
      %cst_52 = arith.constant 1.000000e-24 : f32
      %85 = arith.maximumf %84, %cst_52 : f32
      %86 = math.rsqrt %85 : f32
      %87 = vector.broadcast %86 : f32 to vector<1x64xf32>
      %88 = arith.mulf %79, %87 : vector<1x64xf32>
      %89 = tpu.concatenate %70, %88 in 1 : vector<1x64xf32>, vector<1x64xf32> -> vector<1x128xf32>
      %c0_53 = arith.constant 0 : index
      %c0_54 = arith.constant 0 : index
      %c0_55 = arith.constant 0 : index
      %90 = vector.load %arg15[%c0_53, %c0_54, %c0_55] : memref<1x1x128xf32, #tpu.memory_space<vmem>>, vector<1x1x128xf32>
      %91 = vector.shape_cast %90 : vector<1x1x128xf32> to vector<1x128xf32>
      %92 = vector.shape_cast %89 : vector<1x128xf32> to vector<1x1x128xf32>
      tpu.vector_store %arg15[%c0_53, %c0_54, %c0_55], %92 {strides = array<i32>} : memref<1x1x128xf32, #tpu.memory_space<vmem>>, vector<1x1x128xf32>,
    } else {
    }
    return
  }
  func.func @transform_0(%arg0: i32, %arg1: i32) -> (i32, i32) {
    %c0_i32 = arith.constant 0 : i32
    %c0_i32_0 = arith.constant 0 : i32
    return %c0_i32, %arg0 : i32, i32
  }
  func.func @transform_1(%arg0: i32, %arg1: i32) -> (i32, i32) {
    %c0_i32 = arith.constant 0 : i32
    %c0_i32_0 = arith.constant 0 : i32
    %c0_i32_1 = arith.constant 0 : i32
    return %c0_i32, %c0_i32_0 : i32, i32
  }
  func.func @transform_2(%arg0: i32, %arg1: i32) -> (i32, i32) {
    %c0_i32 = arith.constant 0 : i32
    %c0_i32_0 = arith.constant 0 : i32
    %c0_i32_1 = arith.constant 0 : i32
    return %c0_i32, %c0_i32_0 : i32, i32
  }
  func.func @transform_3(%arg0: i32, %arg1: i32) -> (i32, i32, i32) {
    %c0_i32 = arith.constant 0 : i32
    %c0_i32_0 = arith.constant 0 : i32
    %c0_i32_1 = arith.constant 0 : i32
    return %arg1, %c0_i32, %c0_i32_0 : i32, i32, i32
  }
  func.func @transform_4(%arg0: i32, %arg1: i32) -> (i32, i32, i32) {
    %c0_i32 = arith.constant 0 : i32
    %c0_i32_0 = arith.constant 0 : i32
    %c0_i32_1 = arith.constant 0 : i32
    return %arg1, %c0_i32, %c0_i32_0 : i32, i32, i32
  }
  func.func @transform_5(%arg0: i32, %arg1: i32) -> (i32, i32, i32) {
    %c0_i32 = arith.constant 0 : i32
    %c0_i32_0 = arith.constant 0 : i32
    %c0_i32_1 = arith.constant 0 : i32
    return %arg1, %c0_i32, %c0_i32_0 : i32, i32, i32
  }
  func.func @transform_6(%arg0: i32, %arg1: i32) -> (i32, i32, i32) {
    %c0_i32 = arith.constant 0 : i32
    %c0_i32_0 = arith.constant 0 : i32
    %c0_i32_1 = arith.constant 0 : i32
    return %arg1, %c0_i32, %c0_i32_0 : i32, i32, i32
  }
  func.func @transform_7(%arg0: i32, %arg1: i32) -> (i32, i32, i32) {
    %c0_i32 = arith.constant 0 : i32
    %c0_i32_0 = arith.constant 0 : i32
    %c0_i32_1 = arith.constant 0 : i32
    return %arg1, %c0_i32, %c0_i32_0 : i32, i32, i32
  }
  func.func @transform_8(%arg0: i32, %arg1: i32) -> (i32, i32, i32) {
    %c0_i32 = arith.constant 0 : i32
    %c0_i32_0 = arith.constant 0 : i32
    %c0_i32_1 = arith.constant 0 : i32
    return %arg1, %c0_i32, %c0_i32_0 : i32, i32, i32
  }
  func.func @transform_9(%arg0: i32, %arg1: i32) -> (i32, i32) {
    %c0_i32 = arith.constant 0 : i32
    %c0_i32_0 = arith.constant 0 : i32
    %c0_i32_1 = arith.constant 0 : i32
    return %c0_i32, %c0_i32_0 : i32, i32
  }
  func.func @transform_10(%arg0: i32, %arg1: i32) -> (i32, i32) {
    %c0_i32 = arith.constant 0 : i32
    %c0_i32_0 = arith.constant 0 : i32
    %c0_i32_1 = arith.constant 0 : i32
    return %c0_i32, %c0_i32_0 : i32, i32
  }
  func.func @transform_11(%arg0: i32, %arg1: i32) -> (i32, i32) {
    %c0_i32 = arith.constant 0 : i32
    %c0_i32_0 = arith.constant 0 : i32
    %c0_i32_1 = arith.constant 0 : i32
    return %c0_i32, %c0_i32_0 : i32, i32
  }
  func.func @transform_12(%arg0: i32, %arg1: i32) -> (i32, i32) {
    %c0_i32 = arith.constant 0 : i32
    %c0_i32_0 = arith.constant 0 : i32
    %c0_i32_1 = arith.constant 0 : i32
    return %c0_i32, %c0_i32_0 : i32, i32
  }
  func.func @transform_13(%arg0: i32, %arg1: i32) -> (i32, i32, i32) {
    %c0_i32 = arith.constant 0 : i32
    %c0_i32_0 = arith.constant 0 : i32
    %c0_i32_1 = arith.constant 0 : i32
    return %arg0, %c0_i32, %c0_i32_0 : i32, i32, i32
  }
}

</mosaic_0001>

<bundles_post_ra>
// kernel: tile.9
= control target key start
LH: loop header
LB: loop body
LE: loop exit
PB: predicated region body
PF: predicated region fallthrough
CT: control target
= control target key end

     0   :  { %vm6_vm0 = vcmask 1043458   ;;  %s11_s6 = smov 3  ;;  %s14_s7 = smov 12  ;;  %vm8_vm1 = vcmask 31744   ;;  %vm20_vm2 = vcmask 523744   ;;  %vm32_vm3 = vcmask 490944   ;;  %s381_s0 = inlined_call_operand.vmem [shape: f32[4,16,4], index: 0, kind: input, shape index: {}]   ;;  %s382_s1 = inlined_call_operand.vmem [shape: f32[4,64], index: 1, kind: output, shape index: {}]  }
   0x1   :  { %v196_v0 = vld [vmem:[%s381_s0 + $0xf] ss:$16 sm:%s11_s6]   ;;  %s35_s12 = smov 3  ;;  %s38_s15 = smov 12  ;;  %vm44_vm4 = vcmask 458144   ;;  %vm56_vm5 = vcmask 425344  }
   0x2   :  { %v197_v1 = vld [vmem:[%s381_s0 + $0xf] ss:$16 sm:%s14_s7]   ;;  %v200_v3 = vld [vmem:[%s381_s0 + $0xd] ss:$16 sm:%s35_s12]   ;;  %s241_s16 = smov 60   ;;  %s23_s19 = smov 3 }
   0x3   :  { %v17_v2 = vsel %vm6_vm0, %v197_v1, %v196_v0  ;;  %v201_v4 = vld [vmem:[%s381_s0 + $0xd] ss:$16 sm:%s38_s15]   ;;  %s26_s20 = smov 12  ;;  %v198_v6 = vld [vmem:[%s381_s0 + $0xe] ss:$16 sm:%s23_s19]   ;;  %s47_s23 = smov 3 }
   0x4   :  { %18 = vrot.lane.b32.xlu0 %v17_v2, %s241_s16  ;;  %v41_v5 = vsel %vm6_vm0, %v201_v4, %v200_v3  ;;  %s242_s24 = smov 52   ;;  %v199_v7 = vld [vmem:[%s381_s0 + $0xe] ss:$16 sm:%s26_s20]   ;;  %s50_s27 = smov 12  ;;  %vm68_vm6 = vcmask 392544   ;;  %vm80_vm7 = vcmask 359744  }
   0x5   :  { %42 = vrot.lane.b32.xlu1 %v41_v5, %s242_s24  ;;  %v202_v8 = vld [vmem:[%s381_s0 + $0xc] ss:$16 sm:%s47_s23]   ;;  %v29_v10 = vsel %vm6_vm0, %v199_v7, %v198_v6  ;;  %s83_s3 = smov 3  ;;  %s86_s4 = smov 12  ;;  %vm92_vm8 = vcmask 326944   ;;  %vm104_vm9 = vcmask 294144  }
   0x6   :  { %v203_v9 = vld [vmem:[%s381_s0 + $0xc] ss:$16 sm:%s50_s27]   ;;  %s243_s5 = smov 56   ;;  %s95_s6 = smov 3  ;;  %v208_v12 = vld [vmem:[%s381_s0 + $0x9] ss:$16 sm:%s83_s3]  }
   0x7   :  { %v53_v11 = vsel %vm6_vm0, %v203_v9, %v202_v8  ;;  %s98_s7 = smov 12  ;;  %v209_v13 = vld [vmem:[%s381_s0 + $0x9] ss:$16 sm:%s86_s4]   ;;  %s59_s12 = smov 3  ;;  %v210_v16 = vld [vmem:[%s381_s0 + $0x8] ss:$16 sm:%s95_s6]  }
   0x8   :  { %s62_s13 = smov 12  ;;  %s244_s14 = smov 48   ;;  %v204_v14 = vld [vmem:[%s381_s0 + $0xb] ss:$16 sm:%s59_s12]   ;;  %v211_v17 = vld [vmem:[%s381_s0 + $0x8] ss:$16 sm:%s98_s7]   ;;  %v89_v19 = vsel %vm6_vm0, %v209_v13, %v208_v12 }
   0x9   :  { %v205_v15 = vld [vmem:[%s381_s0 + $0xb] ss:$16 sm:%s62_s13]   ;;  %s245_s23 = smov 44   ;;  %s71_s24 = smov 3  ;;  %v101_v20 = vsel %vm6_vm0, %v211_v17, %v210_v16  ;;  %vm116_vm10 = vcmask 261344   ;;  %vm128_vm11 = vcmask 228544  }
   0xa   :  { %v65_v18 = vsel %vm6_vm0, %v205_v15, %v204_v14  ;;  %s119_s25 = smov 3  ;;  %s74_s26 = smov 12  ;;  %v206_v21 = vld [vmem:[%s381_s0 + $0xa] ss:$16 sm:%s71_s24]   ;;  %vm140_vm12 = vcmask 195744   ;;  %vm152_vm13 = vcmask 162944  }
   0xb   :  { %66 = vrot.lane.b32.xlu2 %v65_v18, %s245_s23  ;;  %s122_s27 = smov 12  ;;  %v207_v22 = vld [vmem:[%s381_s0 + $0xa] ss:$16 sm:%s74_s26]   ;;  %s246_s3 = smov 36   ;;  %vm164_vm14 = vcmask 130144   ;;  %vm176_vm15 = vcmask 97344  }
   0xc   :  { %30 = vrot.lane.b32.xlu0 %v29_v10, %s243_s5  ;;  %v214_v23 = vld [vmem:[%s381_s0 + $0x6] ss:$16 sm:%s119_s25]   ;;  %s131_s6 = smov 3  ;;  %s134_s7 = smov 12  ;;  %v77_v25 = vsel %vm6_vm0, %v207_v22, %v206_v21 }
   0xd   :  { %54 = vrot.lane.b32.xlu1 %v53_v11, %s244_s14  ;;  %s247_s8 = smov 32   ;;  %v215_v24 = vld [vmem:[%s381_s0 + $0x6] ss:$16 sm:%s122_s27]   ;;  %s107_s15 = smov 3 }
   0xe   :  { %v216_v26 = vld [vmem:[%s381_s0 + $0x5] ss:$16 sm:%s131_s6]   ;;  %s110_s16 = smov 12  ;;  %v125_v28 = vsel %vm6_vm0, %v215_v24, %v214_v23  ;;  %s248_s17 = smov 40   ;;  %v212_v30 = vld [vmem:[%s381_s0 + $0x7] ss:$16 sm:%s107_s15]  }
   0xf   :  { %v217_v27 = vld [vmem:[%s381_s0 + $0x5] ss:$16 sm:%s134_s7]   ;;  %s155_s18 = smov 3  ;;  %s158_s19 = smov 12  ;;  %v213_v31 = vld [vmem:[%s381_s0 + $0x7] ss:$16 sm:%s110_s16]  }
  0x10   :  { %v137_v29 = vsel %vm6_vm0, %v217_v27, %v216_v26  ;;  %s249_s24 = smov 24   ;;  %v220_v32 = vld [vmem:[%s381_s0 + $0x3] ss:$16 sm:%s155_s18]   ;;  %s167_s27 = smov 3  ;;  %v113_v34 = vsel %vm6_vm0, %v213_v31, %v212_v30 }
  0x11   :  { %s170_s28 = smov 12  ;;  %s250_s29 = smov 20   ;;  %v221_v33 = vld [vmem:[%s381_s0 + $0x3] ss:$16 sm:%s158_s19]   ;;  %v222_v35 = vld [vmem:[%s381_s0 + $0x2] ss:$16 sm:%s167_s27]  }
  0x12   :  { %v223_v36 = vld [vmem:[%s381_s0 + $0x2] ss:$16 sm:%s170_s28]   ;;  %s143_s7 = smov 3  ;;  %v161_v37 = vsel %vm6_vm0, %v221_v33, %v220_v32  ;;  %s251_s9 = smov 28  }
  0x13   :  { %78 = vrot.lane.b32.xlu2 %v77_v25, %s248_s17  ;;  %v173_v38 = vsel %vm6_vm0, %v223_v36, %v222_v35  ;;  %v218_v39 = vld [vmem:[%s381_s0 + $0x4] ss:$16 sm:%s143_s7]   ;;  %s252_s14 = smov 12   ;;  %s253_s15 = smov 8  }
  0x14   :  { %90 = vrot.lane.b32.xlu0 %v89_v19, %s246_s3  ;;  %s179_s16 = smov 3  ;;  %s182_s17 = smov 12 }
  0x15   :  { %102 = vrot.lane.b32.xlu1 %v101_v20, %s247_s8  ;;  %s146_s8 = smov 12  ;;  %s254_s18 = smov 16   ;;  %v224_v42 = vld [vmem:[%s381_s0 + $0x1] ss:$16 sm:%s179_s16]  }
  0x16   :  { %v219_v40 = vld [vmem:[%s381_s0 + $0x4] ss:$16 sm:%s146_s8]   ;;  %v225_v43 = vld [vmem:[%s381_s0 + $0x1] ss:$16 sm:%s182_s17]   ;;  %s255_s23 = smov 4   ;;  %s4_s25 = smov 12 }
  0x17   :  { %v149_v41 = vsel %vm6_vm0, %v219_v40, %v218_v39  ;;  %v185_v44 = vsel %vm6_vm0, %v225_v43, %v224_v42  ;;  %v5_v46 = vld [vmem:[%s381_s0] ss:$16 sm:%s4_s25]  }
  0x1b   :  { %114 = vrot.lane.b32.xlu2 %v113_v34, %s251_s9 }
  0x1c   :  { %126 = vrot.lane.b32.xlu0 %v125_v28, %s249_s24  ;;  %s2_s24 = smov 3 }
  0x1d   :  { %138 = vrot.lane.b32.xlu1 %v137_v29, %s250_s29  ;;  %v3_v45 = vld [vmem:[%s381_s0] ss:$16 sm:%s2_s24]  }
  0x1e   :  { %v7_v47 = vsel %vm6_vm0, %v5_v46, %v3_v45  ;;  %vm188_vm0 = vcmask 64544  }
  0x1f   :  { %9 = vst.msk [vmem:[#allocation0] sm:$0xf] %vm8_vm1, %v7_v47  }
  0x23   :  { %150 = vrot.lane.b32.xlu2 %v149_v41, %s254_s18 }
  0x24   :  { %162 = vrot.lane.b32.xlu0 %v161_v37, %s252_s14 }
  0x25   :  { %174 = vrot.lane.b32.xlu1 %v173_v38, %s253_s15 }
  0x2b   :  { %186 = vrot.lane.b32.xlu2 %v185_v44, %s255_s23 }
  0x65   :  { %v67_v48 = vpop.permute.xlu2 %66  }
  0x6d   :  { %v79_v49 = vpop.permute.xlu2 %78  }
  0x75   :  { %v115_v52 = vpop.permute.xlu2 %114  }
  0x76   :  { %v19_v50 = vpop.permute.xlu0 %18  }
  0x77   :  { %21 = vst.msk [vmem:[#allocation0] sm:$0xf] %vm20_vm2, %v19_v50   ;;  %v43_v51 = vpop.permute.xlu1 %42  }
  0x7d   :  { %v151_v55 = vpop.permute.xlu2 %150  }
  0x7e   :  { %v31_v53 = vpop.permute.xlu0 %30  }
  0x7f   :  { %33 = vst.msk [vmem:[#allocation0] sm:$0xf] %vm32_vm3, %v31_v53   ;;  %v55_v54 = vpop.permute.xlu1 %54  }
  0x80   :  { %45 = vst.msk [vmem:[#allocation0] sm:$0xf] %vm44_vm4, %v43_v51  }
  0x81   :  { %57 = vst.msk [vmem:[#allocation0] sm:$0xf] %vm56_vm5, %v55_v54  }
  0x82   :  { %69 = vst.msk [vmem:[#allocation0] sm:$0xf] %vm68_vm6, %v67_v48  }
  0x83   :  { %81 = vst.msk [vmem:[#allocation0] sm:$0xf] %vm80_vm7, %v79_v49  }
  0x85   :  { %v187_v58 = vpop.permute.xlu2 %186  }
  0x86   :  { %v91_v56 = vpop.permute.xlu0 %90  }
  0x87   :  { %93 = vst.msk [vmem:[#allocation0] sm:$0xf] %vm92_vm8, %v91_v56   ;;  %v103_v57 = vpop.permute.xlu1 %102  }
  0x88   :  { %105 = vst.msk [vmem:[#allocation0] sm:$0xf] %vm104_vm9, %v103_v57  }
  0x89   :  { %117 = vst.msk [vmem:[#allocation0] sm:$0xf] %vm116_vm10, %v115_v52  }
  0x8e   :  { %v127_v59 = vpop.permute.xlu0 %126  }
  0x8f   :  { %129 = vst.msk [vmem:[#allocation0] sm:$0xf] %vm128_vm11, %v127_v59   ;;  %v139_v60 = vpop.permute.xlu1 %138  }
  0x90   :  { %141 = vst.msk [vmem:[#allocation0] sm:$0xf] %vm140_vm12, %v139_v60  }
  0x91   :  { %153 = vst.msk [vmem:[#allocation0] sm:$0xf] %vm152_vm13, %v151_v55  }
  0x96   :  { %v163_v61 = vpop.permute.xlu0 %162  }
  0x97   :  { %165 = vst.msk [vmem:[#allocation0] sm:$0xf] %vm164_vm14, %v163_v61   ;;  %v175_v62 = vpop.permute.xlu1 %174  }
  0x98   :  { %177 = vst.msk [vmem:[#allocation0] sm:$0xf] %vm176_vm15, %v175_v62  }
  0x99   :  { %189 = vst.msk [vmem:[#allocation0] sm:$0xf] %vm188_vm0, %v187_v58  }
  0xa0   :  { %v192_v63 = vld [vmem:[#allocation0] sm:$0xf] }
  0xa1   :  { %195 = vst [vmem:[%s382_s1] sm:$0xf] %v192_v63 }

// kernel: vpr_forward.1
= control target key start
LH: loop header
LB: loop body
LE: loop exit
PB: predicated region body
PF: predicated region fallthrough
CT: control target
= control target key end

     0   :  { %s2798_s25 = smov 0   ;;  %s2800_s26 = smov 0   ;;  %s3588_s0 = inlined_call_operand.vmem [shape: bf16[36,512], index: 0, kind: input, shape index: {}]   ;;  %s3589_s1 = inlined_call_operand.vmem [shape: bf16[32,36], index: 1, kind: input, shape index: {}]   ;;  %s3590_s2 = inlined_call_operand.vmem [shape: f32[32,1], index: 2, kind: input, shape index: {}]   ;;  %s3591_s3 = inlined_call_operand.vmem [shape: f32[2,1,256], index: 3, kind: input, shape index: {}]   ;;  %s3592_s4 = inlined_call_operand.vmem [shape: f32[2,1,256], index: 4, kind: input, shape index: {}]   ;;  %s3593_s5 = inlined_call_operand.vmem [shape: bf16[2,256,256], index: 5, kind: input, shape index: {}]   ;;  %s3594_s6 = inlined_call_operand.vmem [shape: f32[2,1,256], index: 6, kind: input, shape index: {}]   ;;  %s3595_s7 = inlined_call_operand.vmem [shape: bf16[2,256,256], index: 7, kind: input, shape index: {}]   ;;  %s3596_s8 = inlined_call_operand.vmem [shape: f32[2,1,256], index: 8, kind: input, shape index: {}]   ;;  %s3597_s9 = inlined_call_operand.vmem [shape: f32[256,4], index: 9, kind: input, shape index: {}]   ;;  %s3598_s10 = inlined_call_operand.vmem [shape: f32[32,64], index: 10, kind: input, shape index: {}]   ;;  %s3599_s11 = inlined_call_operand.vmem [shape: f32[4,64], index: 11, kind: input, shape index: {}]   ;;  %s3600_s12 = inlined_call_operand.vmem [shape: f32[1,64], index: 12, kind: input, shape index: {}]   ;;  %s3601_s13 = inlined_call_operand.vmem [shape: f32[1,1,128], index: 13, kind: output, shape index: {}]  }
   0x1   :  { %3604 = sst [smem:[#allocation6_spill]] %s3601_s13  ;;  %s2802_s27 = smov 0  }
   0x2 LB: > { %3605 = sst [smem:[#allocation3_spill]] %s2718_s26  ;;  %s32_s28 = sadd.s32 1, %s2718_s26  ;;  %s2722_s27 = sphi %s2802_s27, %s23_s27   ;;  %s2718_s26 = sphi %s2800_s26, %s3617_s26   ;;  %s2714_s25 = sphi %s2798_s25, %s3616_s25  }
   0x3   : > { %3606 = sst [smem:[#allocation4_spill]] %s2722_s27  ;;  %p2188_p0 = scmp.ge.s32.totalorder %s2722_s27, 1 }
   0x4   : > { %p33_p1 = scmp.ge.s32.totalorder %s32_s28, 2  ;;  %p456_p2 = scmp.lt.s32.totalorder %s2722_s27, 3 }
   0x6   : > { %s3619_s28 = smov (%p33_p1, %s32_s28), 0  ;;  %p457_p3 = pnand %p2188_p0, %p456_p2 }
   0x7   : > { %3607 = sst [smem:[#allocation5_spill]] %s3619_s28  ;;  %p530_p4 = scmp.lt.s32.totalorder (!%p457_p3), %s2714_s25, 1 }
   0x8   : > { %460 = sbr.rel (%p457_p3) target bundleno = 1603 (0x643), region = 72  ;;  %p2197_p5 = scmp.ne.s32.totalorder (!%p457_p3), %s2714_s25, 0 }
   0xd   : > { %s531_s29 = scalar_select %p530_p4, %s2714_s25, 1 }
   0xe   : > { %563 = sbr.rel (%p2197_p5) target bundleno = 199 (0xc7), region = 76 }
   0xf   : > { %s2820_s30 = sshll.u32 %s531_s29, 1  ;;  %s2516_s14 = sshll.u32 %s531_s29, 8 }
  0x10   : > { %s537_s20 = scalar_lea.vmem %s3592_s4, %s2820_s30  ;;  %s2833_s23 = scalar_lea.vmem %s3593_s5, %s2516_s14 }
  0x11   : > { %s546_s26 = scalar_lea.vmem %s3594_s6, %s2820_s30  ;;  %s2842_s29 = scalar_lea.vmem %s3595_s7, %s2516_s14 }
  0x13   : > { %v576_v0 = vld [vmem:[%s3588_s0 + $0x40] sm:$0x33]  ;;  %v577_v1 = vld [vmem:[%s3588_s0 + $0x48] sm:$0x33]  ;;  %vm669_vm0 = vcmask 1041408   ;;  %v2724_v35 = vmov 0  }
  0x14   : > { %v638_v2 = vunpack.c.l.b16 %v576_v0  ;;  %v639_v3 = vunpack.c.h.b16 %v576_v0  ;;  %v640_v4 = vunpack.c.l.b16 %v577_v1  ;;  %v641_v5 = vunpack.c.h.b16 %v577_v1  ;;  %v2224_v6 = vld [vmem:[%s3588_s0 + $0x20] sm:$0xf]  ;;  %v2526_v7 = vld [vmem:[%s3588_s0 + $0x2c] sm:$0xf0]  ;;  %v2524_v12 = vld [vmem:[%s3588_s0 + $0x24] sm:$0xf]  ;;  %2660 = vset.pattern.permute.xlu0 %v2724_v35  ;;  %2661 = vset.pattern.permute.xlu1 %v2724_v35 }
  0x15   : > { %v2226_v13 = vld [vmem:[%s3588_s0 + $0x30] sm:$0xf0]  ;;  %v2232_v14 = vld [vmem:[%s3588_s0 + $0x28] sm:$0xf]  ;;  %v2527_v15 = vld [vmem:[%s3588_s0 + $0x34] sm:$0xf0]  ;;  %v2225_v23 = vor.u32 %v2526_v7, %v2224_v6 }
  0x16   : > { %v650_v8 = vpack.c.b16 %v638_v2, %v638_v2  ;;  %v651_v9 = vpack.c.b16 %v639_v3, %v639_v3  ;;  %v652_v10 = vpack.c.b16 %v640_v4, %v640_v4  ;;  %v653_v11 = vpack.c.b16 %v641_v5, %v641_v5  ;;  %v2525_v16 = vld [vmem:[%s3588_s0 + $0x2c] sm:$0xf]  ;;  %v2234_v17 = vld [vmem:[%s3588_s0 + $0x38] sm:$0xf0]  ;;  %v2208_v22 = vld [vmem:[%s3588_s0] sm:$0xf] }
  0x17   : > { %v2229_v24 = vor.u32 %v2524_v12, %v2226_v13  ;;  %v2522_v25 = vld [vmem:[%s3588_s0 + $0xc] sm:$0xf0]  ;;  %v2520_v26 = vld [vmem:[%s3588_s0 + $0x4] sm:$0xf]  ;;  %v2210_v27 = vld [vmem:[%s3588_s0 + $0x10] sm:$0xf0]  ;;  %v2233_v28 = vor.u32 %v2527_v15, %v2232_v14  ;;  %v2237_v29 = vor.u32 %v2525_v16, %v2234_v17 }
  0x18   : > { %v671_v18 = vsel %vm669_vm0, %v650_v8, 0  ;;  %v674_v19 = vsel %vm669_vm0, %v651_v9, 0  ;;  %v677_v20 = vsel %vm669_vm0, %v652_v10, 0  ;;  %v680_v21 = vsel %vm669_vm0, %v653_v11, 0  ;;  %v2216_v30 = vld [vmem:[%s3588_s0 + $0x8] sm:$0xf] }
  0x19   : > { %687 = vmatpush.bf16.msra.mxu0 %v671_v18  ;;  %706 = vmatpush.bf16.msra.mxu1 %v674_v19  ;;  %v2523_v31 = vld [vmem:[%s3588_s0 + $0x14] sm:$0xf0]  ;;  %v578_v32 = vld [vmem:[%s3590_s2] sm:$0xff]  ;;  %v2521_v33 = vld [vmem:[%s3588_s0 + $0xc] sm:$0xf]  ;;  %v2209_v37 = vor.u32 %v2522_v25, %v2208_v22  ;;  %v2213_v38 = vor.u32 %v2520_v26, %v2210_v27  ;;  %vm662_vm1 = vcmask 293888  }
  0x1a   : > { %725 = vmatpush.bf16.msra.mxu2 %v677_v20  ;;  %744 = vmatpush.bf16.msra.mxu3 %v680_v21  ;;  %v2218_v34 = vld [vmem:[%s3588_s0 + $0x18] sm:$0xf0]  ;;  %v580_v36 = vld [vmem:[%s3590_s2 + $0x10] sm:$0xff]  ;;  %v2217_v39 = vor.u32 %v2523_v31, %v2216_v30  ;;  %v2518_v41 = vld [vmem:[%s3589_s1] sm:$0xff] }
  0x1b   : > { %584 = vperm.xlu0 %2660, %v578_v32   ;;  %594 = vperm.xlu1 %2661, %v580_v36   ;;  %v2221_v40 = vor.u32 %v2521_v33, %v2218_v34  ;;  %v579_v42 = vld [vmem:[%s3590_s2 + $0x8] sm:$0xff]  ;;  %v581_v43 = vld [vmem:[%s3590_s2 + $0x18] sm:$0xff] }
  0x1c   : > { %v2519_v44 = vld [vmem:[%s3589_s1 + $0x8] sm:$0xff] }
  0x1d   : > { %688 = vmatpush.bf16.msra.mxu0 %v2225_v23  ;;  %707 = vmatpush.bf16.msra.mxu1 %v2229_v24 }
  0x1e   : > { %726 = vmatpush.bf16.msra.mxu2 %v2233_v28  ;;  %745 = vmatpush.bf16.msra.mxu3 %v2237_v29 }
  0x21   : > { %689 = vmatpush.bf16.msra.mxu0 %v2209_v37  ;;  %708 = vmatpush.bf16.msra.mxu1 %v2213_v38 }
  0x22   : > { %727 = vmatpush.bf16.msra.mxu2 %v2217_v39  ;;  %746 = vmatpush.bf16.msra.mxu3 %v2221_v40 }
  0x23   : > { %589 = vperm.xlu0 %2660, %v579_v42   ;;  %599 = vperm.xlu1 %2661, %v581_v43  }
  0x24   : > { %2238 = vmatmul.msk.bf16.vlgmr.msra.gmra.mxu0 %vm662_vm1, %v2518_v41  ;;  %2240 = vmatmul.msk.bf16.vlgmr.msra.gmra.mxu1 %vm662_vm1, %v2518_v41 }
  0x25   : > { %2242 = vmatmul.msk.bf16.vlgmr.msra.gmra.mxu2 %vm662_vm1, %v2518_v41  ;;  %2244 = vmatmul.msk.bf16.vlgmr.msra.gmra.mxu3 %vm662_vm1, %v2518_v41 }
  0x34   : > { %2239 = vmatmul.msk.bf16.gmra.mxu0 %vm662_vm1, %v2519_v44  ;;  %2241 = vmatmul.msk.bf16.gmra.mxu1 %vm662_vm1, %v2519_v44 }
  0x35   : > { %2243 = vmatmul.msk.bf16.gmra.mxu2 %vm662_vm1, %v2519_v44  ;;  %2245 = vmatmul.msk.bf16.gmra.mxu3 %vm662_vm1, %v2519_v44 }
  0x8d   : > { %v585_v45 = vpop.permute.xlu0 %584  ;;  %v595_v1 = vpop.permute.xlu1 %594 }
  0x95   : > { %v590_v52 = vpop.permute.xlu0 %589  ;;  %v600_v14 = vpop.permute.xlu1 %599 }
  0xa1   : > { %v691_v46 = vpop.f32.mrf.mxu0  ;;  %v710_v47 = vpop.f32.mrf.mxu1 }
  0xa2   : > { %v692_v48 = vadd.f32 %v691_v46, %v585_v45  ;;  %v711_v49 = vadd.f32 %v710_v47, %v585_v45 }
  0xa4   : > { %v758_v50 = vmax.f32 %v692_v48, 0.0  ;;  %v759_v51 = vmax.f32 %v711_v49, 0.0 }
  0xa6   : > { %774 = vst [vmem:[#allocation2 + $0x30] sm:$0xff] %v758_v50 }
  0xa7   : > { %775 = vst [vmem:[#allocation2] sm:$0xff] %v759_v51 }
  0xa8   : > { %v729_v53 = vpop.f32.mrf.mxu2  ;;  %v748_v54 = vpop.f32.mrf.mxu3 }
  0xa9   : > { %v730_v55 = vadd.f32 %v729_v53, %v585_v45  ;;  %v749_v56 = vadd.f32 %v748_v54, %v585_v45  ;;  %v693_v57 = vpop.f32.mrf.mxu0  ;;  %v712_v58 = vpop.f32.mrf.mxu1 }
  0xaa   : > { %v694_v59 = vadd.f32 %v693_v57, %v590_v52  ;;  %v713_v60 = vadd.f32 %v712_v58, %v590_v52 }
  0xab   : > { %v760_v61 = vmax.f32 %v730_v55, 0.0  ;;  %v761_v62 = vmax.f32 %v749_v56, 0.0 }
  0xac   : > { %v762_v63 = vmax.f32 %v694_v59, 0.0  ;;  %v763_v0 = vmax.f32 %v713_v60, 0.0 }
  0xad   : > { %782 = vst [vmem:[#allocation2 + $0x40] sm:$0xff] %v760_v61 }
  0xae   : > { %783 = vst [vmem:[#allocation2 + $0x20] sm:$0xff] %v761_v62 }
  0xaf   : > { %776 = vst [vmem:[#allocation2 + $0x58] sm:$0xff] %v762_v63 }
  0xb0   : > { %777 = vst [vmem:[#allocation2 + $0x18] sm:$0xff] %v763_v0  ;;  %v731_v2 = vpop.f32.mrf.mxu2  ;;  %v750_v3 = vpop.f32.mrf.mxu3 }
  0xb1   : > { %v732_v4 = vadd.f32 %v731_v2, %v590_v52  ;;  %v751_v5 = vadd.f32 %v750_v3, %v590_v52  ;;  %v696_v6 = vpop.f32.mrf.mxu0  ;;  %v715_v7 = vpop.f32.mrf.mxu1 }
  0xb2   : > { %v697_v8 = vadd.f32 %v696_v6, %v595_v1  ;;  %v716_v9 = vadd.f32 %v715_v7, %v595_v1 }
  0xb3   : > { %v764_v10 = vmax.f32 %v732_v4, 0.0  ;;  %v765_v11 = vmax.f32 %v751_v5, 0.0 }
  0xb4   : > { %v766_v12 = vmax.f32 %v697_v8, 0.0  ;;  %v767_v13 = vmax.f32 %v716_v9, 0.0 }
  0xb5   : > { %784 = vst [vmem:[#allocation2 + $0x10] sm:$0xff] %v764_v10 }
  0xb6   : > { %785 = vst [vmem:[#allocation2 + $0x38] sm:$0xff] %v765_v11 }
  0xb7   : > { %778 = vst [vmem:[#allocation2 + $0x50] sm:$0xff] %v766_v12 }
  0xb8   : > { %779 = vst [vmem:[#allocation2 + $0x68] sm:$0xff] %v767_v13  ;;  %v734_v15 = vpop.f32.mrf.mxu2  ;;  %v753_v16 = vpop.f32.mrf.mxu3 }
  0xb9   : > { %v735_v17 = vadd.f32 %v734_v15, %v595_v1  ;;  %v754_v18 = vadd.f32 %v753_v16, %v595_v1  ;;  %v698_v19 = vpop.f32.mrf.mxu0  ;;  %v717_v20 = vpop.f32.mrf.mxu1 }
  0xba   : > { %v699_v21 = vadd.f32 %v698_v19, %v600_v14  ;;  %v718_v22 = vadd.f32 %v717_v20, %v600_v14 }
  0xbb   : > { %v768_v23 = vmax.f32 %v735_v17, 0.0  ;;  %v769_v24 = vmax.f32 %v754_v18, 0.0 }
  0xbc   : > { %v770_v25 = vmax.f32 %v699_v21, 0.0  ;;  %v771_v26 = vmax.f32 %v718_v22, 0.0 }
  0xbd   : > { %786 = vst [vmem:[#allocation2 + $0x60] sm:$0xff] %v768_v23 }
  0xbe   : > { %787 = vst [vmem:[#allocation2 + $0x70] sm:$0xff] %v769_v24 }
  0xbf   : > { %780 = vst [vmem:[#allocation2 + $0x8] sm:$0xff] %v770_v25 }
  0xc0   : > { %781 = vst [vmem:[#allocation2 + $0x48] sm:$0xff] %v771_v26  ;;  %v736_v27 = vpop.f32.mrf.mxu2  ;;  %v755_v28 = vpop.f32.mrf.mxu3 }
  0xc1   : > { %v737_v29 = vadd.f32 %v736_v27, %v600_v14  ;;  %v756_v30 = vadd.f32 %v755_v28, %v600_v14 }
  0xc3   : > { %v772_v31 = vmax.f32 %v737_v29, 0.0  ;;  %v773_v32 = vmax.f32 %v756_v30, 0.0 }
  0xc5   : > { %788 = vst [vmem:[#allocation2 + $0x78] sm:$0xff] %v772_v31 }
  0xc6   : > { %789 = vst [vmem:[#allocation2 + $0x28] sm:$0xff] %v773_v32 }
  0xc7 PF: > { %v2925_v33 = vld [vmem:[#allocation2 + $0x40] sm:$0xff]  ;;  %v794_v35 = vld [vmem:[#allocation2 + $0x50] sm:$0xff]  ;;  %v795_v37 = vld [vmem:[#allocation2 + $0x68] sm:$0xff]  ;;  %v2725_v57 = vmov 256.0   ;;  %s3608_s19 = scalar_lea.vmem %s3591_s3, %s2820_s30  ;;  %s3613_s27 = scalar_lea.vmem %s3596_s8, %s2820_s30 }
  0xc8   : > { %v2927_v34 = vld [vmem:[#allocation2 + $0x20] sm:$0xff]  ;;  %v790_v38 = vld [vmem:[#allocation2 + $0x30] sm:$0xff]  ;;  %v812_v40 = vadd.f32 %v795_v37, %v794_v35  ;;  %v801_v43 = vld [vmem:[#allocation2 + $0x38] sm:$0xff]  ;;  %2662 = vrcp.f32 %v2725_v57  ;;  %p2502_p6 = scmp.ne.s32.totalorder %s2714_s25, 1 }
  0xc9   : > { %v818_v36 = vadd.f32 %v2927_v34, %v2925_v33  ;;  %v791_v39 = vld [vmem:[#allocation2] sm:$0xff]  ;;  %v800_v42 = vld [vmem:[#allocation2 + $0x10] sm:$0xff]  ;;  %v796_v44 = vld [vmem:[#allocation2 + $0x8] sm:$0xff]  ;;  %s2726_s16 = smov (!%p2502_p6), 1e-24   ;;  %s2727_s21 = smov (!%p2502_p6), 64  }
  0xca   : > { %v806_v41 = vadd.f32 %v791_v39, %v790_v38  ;;  %813 = vadd.xlane.f32.xlu1 %v812_v40  ;;  %v797_v45 = vld [vmem:[#allocation2 + $0x48] sm:$0xff]  ;;  %v792_v46 = vld [vmem:[#allocation2 + $0x58] sm:$0xff]  ;;  %v821_v48 = vadd.f32 %v801_v43, %v800_v42  ;;  %v2931_v51 = vld [vmem:[#allocation2 + $0x60] sm:$0xff]  ;;  %s3614_s13 = sld [smem:[#allocation6_spill]] (!%p2502_p6) }
  0xcb   : > { %819 = vadd.xlane.f32.xlu2 %v818_v36  ;;  %v793_v47 = vld [vmem:[#allocation2 + $0x18] sm:$0xff]  ;;  %v815_v49 = vadd.f32 %v797_v45, %v796_v44  ;;  %v2933_v52 = vld [vmem:[#allocation2 + $0x70] sm:$0xff] }
  0xcc   : > { %807 = vadd.xlane.f32.xlu0 %v806_v41  ;;  %v809_v50 = vadd.f32 %v793_v47, %v792_v46  ;;  %v2935_v53 = vld [vmem:[#allocation2 + $0x78] sm:$0xff]  ;;  %v824_v55 = vadd.f32 %v2933_v52, %v2931_v51 }
  0xcd   : > { %v2937_v54 = vld [vmem:[#allocation2 + $0x28] sm:$0xff] }
  0xce   : > { %v827_v56 = vadd.f32 %v2937_v54, %v2935_v53  ;;  %v2663_v58 = vpop.eup %2662 }
  0xcf   : > { %v831_v59 = vmul.f32 256.0, %v2663_v58  ;;  %vm835_vm2 = vweird.f32 %v2663_v58 }
  0xd1   : > { %v832_v60 = vsub.f32 1.0, %v831_v59 }
  0xd2   : > { %816 = vadd.xlane.f32.xlu1 %v815_v49 }
  0xd3   : > { %822 = vadd.xlane.f32.xlu2 %v821_v48  ;;  %v833_v61 = vmul.f32 %v2663_v58, %v832_v60  ;;  %v2559_v60 = vld [vmem:[%s2833_s23 + $0xf4] sm:$0xf0] }
  0xd4   : > { %810 = vadd.xlane.f32.xlu0 %v809_v50 }
  0xd5   : > { %v834_v62 = vadd.f32 %v2663_v58, %v833_v61  ;;  %v2542_v61 = vld [vmem:[%s2833_s23 + $0x74] sm:$0xf] }
  0xd7   : > { %v2943_v63 = vsel %vm835_vm2, %v2663_v58, %v834_v62  ;;  %v2543_v58 = vld [vmem:[%s2833_s23 + $0x74] sm:$0xf0]  ;;  %v2306_v62 = vld [vmem:[%s2833_s23 + $0x78] sm:$0xf0] }
  0xda   : > { %828 = vadd.xlane.f32.xlu1 %v827_v56 }
  0xdc   : > { %825 = vadd.xlane.f32.xlu0 %v824_v55 }
 0x13d   : > { %v814_v1 = vpop.xlane.xlu1 %813 }
 0x13e   : > { %v820_v0 = vpop.xlane.xlu2 %819  ;;  %v839_v3 = vmul.f32 %v2943_v63, %v814_v1  ;;  %v2309_v1 = vor.u32 %v2542_v61, %v2306_v62  ;;  %v2551_v61 = vld [vmem:[%s2833_s23 + $0xb4] sm:$0xf0]  ;;  %v2534_v62 = vld [vmem:[%s2833_s23 + $0x34] sm:$0xf] }
 0x13f   : > { %v808_v2 = vpop.xlane.xlu0 %807  ;;  %v841_v21 = vmul.f32 %v2943_v63, %v820_v0 }
 0x140   : > { %v837_v4 = vmul.f32 %v2943_v63, %v808_v2  ;;  %v2947_v5 = vsub.f32 %v794_v35, %v839_v3  ;;  %v2949_v6 = vsub.f32 %v795_v37, %v839_v3  ;;  %v2558_v2 = vld [vmem:[%s2833_s23 + $0xf4] sm:$0xf]  ;;  %v2370_v3 = vld [vmem:[%s2833_s23 + $0xf8] sm:$0xf0]  ;;  %1321 = vmatpush.bf16.msra.mxu2 %v2309_v1 }
 0x141   : > { %v2992_v36 = vsub.f32 %v2925_v33, %v841_v21  ;;  %v2995_v37 = vsub.f32 %v2927_v34, %v841_v21  ;;  %v2288_v21 = vld [vmem:[%s2833_s23 + $0x50] sm:$0xf] }
 0x142   : > { %v2951_v7 = vsub.f32 %v790_v38, %v837_v4  ;;  %v2953_v8 = vsub.f32 %v791_v39, %v837_v4  ;;  %v865_v9 = vmul.f32 %v2947_v5, %v2947_v5  ;;  %v866_v10 = vmul.f32 %v2949_v6, %v2949_v6 }
 0x143   : > { %v870_v33 = vmul.f32 %v2995_v37, %v2995_v37  ;;  %v2373_v4 = vor.u32 %v2558_v2, %v2370_v3  ;;  %v2550_v3 = vld [vmem:[%s2833_s23 + $0xb4] sm:$0xf] }
 0x144   : > { %v861_v11 = vmul.f32 %v2951_v7, %v2951_v7  ;;  %v862_v12 = vmul.f32 %v2953_v8, %v2953_v8  ;;  %v883_v14 = vadd.f32 %v866_v10, %v865_v9  ;;  %v2296_v9 = vld [vmem:[%s2833_s23 + $0x60] sm:$0xf]  ;;  %v2541_v10 = vld [vmem:[%s2833_s23 + $0x64] sm:$0xf0] }
 0x145   : > { %v817_v17 = vpop.xlane.xlu1 %816  ;;  %1350 = vmatpush.bf16.msra.mxu3 %v2373_v4  ;;  %v2338_v4 = vld [vmem:[%s2833_s23 + $0xb8] sm:$0xf0] }
 0x146   : > { %v823_v13 = vpop.xlane.xlu2 %822  ;;  %v877_v15 = vadd.f32 %v862_v12, %v861_v11  ;;  %v840_v19 = vmul.f32 %v2943_v63, %v817_v17  ;;  %884 = vadd.xlane.f32.xlu1 %v883_v14  ;;  %v2360_v11 = vld [vmem:[%s2833_s23 + $0xe0] sm:$0xf]  ;;  %v2297_v12 = vor.u32 %v2541_v10, %v2296_v9  ;;  %v2540_v14 = vld [vmem:[%s2833_s23 + $0x64] sm:$0xf]  ;;  %v2341_v9 = vor.u32 %v2550_v3, %v2338_v4 }
 0x147   : > { %v842_v16 = vmul.f32 %v2943_v63, %v823_v13  ;;  %v811_v18 = vpop.xlane.xlu0 %810  ;;  %v2557_v13 = vld [vmem:[%s2833_s23 + $0xe4] sm:$0xf0]  ;;  %v2264_v10 = vld [vmem:[%s2833_s23 + $0x20] sm:$0xf] }
 0x148   : > { %v838_v20 = vmul.f32 %v2943_v63, %v811_v18  ;;  %878 = vadd.xlane.f32.xlu2 %v877_v15  ;;  %v2971_v24 = vsub.f32 %v796_v44, %v840_v19  ;;  %v2973_v25 = vsub.f32 %v797_v45, %v840_v19  ;;  %v869_v45 = vmul.f32 %v2992_v36, %v2992_v36  ;;  %v2298_v15 = vld [vmem:[%s2833_s23 + $0x68] sm:$0xf0]  ;;  %v2556_v18 = vld [vmem:[%s2833_s23 + $0xe4] sm:$0xf] }
 0x149   : > { %v2967_v22 = vsub.f32 %v800_v42, %v842_v16  ;;  %v2969_v23 = vsub.f32 %v801_v43, %v842_v16  ;;  %v2361_v16 = vor.u32 %v2557_v13, %v2360_v11  ;;  %v2301_v17 = vor.u32 %v2540_v14, %v2298_v15  ;;  %v2362_v19 = vld [vmem:[%s2833_s23 + $0xe8] sm:$0xf0]  ;;  %v2533_v11 = vld [vmem:[%s2833_s23 + $0x24] sm:$0xf0]  ;;  %v2532_v15 = vld [vmem:[%s2833_s23 + $0x24] sm:$0xf] }
 0x14a   : > { %v2975_v26 = vsub.f32 %v792_v46, %v838_v20  ;;  %v2977_v27 = vsub.f32 %v793_v47, %v838_v20  ;;  %v867_v30 = vmul.f32 %v2971_v24, %v2971_v24  ;;  %v868_v31 = vmul.f32 %v2973_v25, %v2973_v25  ;;  %v2549_v14 = vld [vmem:[%s2833_s23 + $0xa4] sm:$0xf0] }
 0x14b   : > { %v871_v28 = vmul.f32 %v2967_v22, %v2967_v22  ;;  %v872_v29 = vmul.f32 %v2969_v23, %v2969_v23  ;;  %v2365_v20 = vor.u32 %v2556_v18, %v2362_v19  ;;  %1322 = vmatpush.bf16.msra.mxu2 %v2301_v17  ;;  %v2265_v13 = vor.u32 %v2533_v11, %v2264_v10  ;;  %v2548_v19 = vld [vmem:[%s2833_s23 + $0xa4] sm:$0xf] }
 0x14c   : > { %v863_v32 = vmul.f32 %v2975_v26, %v2975_v26  ;;  %v864_v35 = vmul.f32 %v2977_v27, %v2977_v27  ;;  %v886_v39 = vadd.f32 %v868_v31, %v867_v30  ;;  %v2555_v31 = vld [vmem:[%s2833_s23 + $0xd4] sm:$0xf0] }
 0x14d   : > { %v892_v38 = vadd.f32 %v872_v29, %v871_v28  ;;  %v829_v42 = vpop.xlane.xlu1 %828  ;;  %v2539_v28 = vld [vmem:[%s2833_s23 + $0x54] sm:$0xf0]  ;;  %v2352_v29 = vld [vmem:[%s2833_s23 + $0xd0] sm:$0xf]  ;;  %1351 = vmatpush.bf16.msra.mxu3 %v2365_v20  ;;  %v2330_v20 = vld [vmem:[%s2833_s23 + $0xa8] sm:$0xf0] }
 0x14e   : > { %v880_v40 = vadd.f32 %v864_v35, %v863_v32  ;;  %v844_v44 = vmul.f32 %v2943_v63, %v829_v42  ;;  %v2289_v30 = vor.u32 %v2539_v28, %v2288_v21  ;;  %v2538_v32 = vld [vmem:[%s2833_s23 + $0x54] sm:$0xf]  ;;  %v2290_v35 = vld [vmem:[%s2833_s23 + $0x58] sm:$0xf0]  ;;  %v2333_v21 = vor.u32 %v2548_v19, %v2330_v20  ;;  %v2256_v28 = vld [vmem:[%s2833_s23 + $0x10] sm:$0xf] }
 0x14f   : > { %v826_v41 = vpop.xlane.xlu0 %825  ;;  %893 = vadd.xlane.f32.xlu1 %v892_v38  ;;  %v2353_v38 = vor.u32 %v2555_v31, %v2352_v29  ;;  %v2531_v29 = vld [vmem:[%s2833_s23 + $0x14] sm:$0xf0] }
 0x150   : > { %v843_v43 = vmul.f32 %v2943_v63, %v826_v41  ;;  %887 = vadd.xlane.f32.xlu2 %v886_v39  ;;  %881 = vadd.xlane.f32.xlu0 %v880_v40  ;;  %v3014_v49 = vsub.f32 %v2935_v53, %v844_v44  ;;  %v3017_v50 = vsub.f32 %v2937_v54, %v844_v44  ;;  %v2304_v53 = vld [vmem:[%s2833_s23 + $0x70] sm:$0xf]  ;;  %v2554_v40 = vld [vmem:[%s2833_s23 + $0xd4] sm:$0xf]  ;;  %v2354_v41 = vld [vmem:[%s2833_s23 + $0xd8] sm:$0xf0] }
 0x151   : > { %v2368_v54 = vld [vmem:[%s2833_s23 + $0xf0] sm:$0xf]  ;;  %v2305_v59 = vor.u32 %v2543_v58, %v2304_v53  ;;  %v2293_v39 = vor.u32 %v2538_v32, %v2290_v35  ;;  %v2357_v42 = vor.u32 %v2554_v40, %v2354_v41  ;;  %v2537_v44 = vld [vmem:[%s2833_s23 + $0x44] sm:$0xf0]  ;;  %v2257_v32 = vor.u32 %v2531_v29, %v2256_v28  ;;  %v2547_v35 = vld [vmem:[%s2833_s23 + $0x94] sm:$0xf0] }
 0x152   : > { %v3004_v34 = vsub.f32 %v2931_v51, %v843_v43  ;;  %v3007_v46 = vsub.f32 %v2933_v52, %v843_v43  ;;  %v889_v51 = vadd.f32 %v870_v33, %v869_v45  ;;  %v875_v52 = vmul.f32 %v3014_v49, %v3014_v49  ;;  %v2280_v43 = vld [vmem:[%s2833_s23 + $0x40] sm:$0xf]  ;;  %v2272_v58 = vld [vmem:[%s2833_s23 + $0x30] sm:$0xf] }
 0x153   : > { %v876_v56 = vmul.f32 %v3017_v50, %v3017_v50  ;;  %v2369_v0 = vor.u32 %v2559_v60, %v2368_v54  ;;  %1263 = vmatpush.bf16.msra.mxu0 %v2305_v59  ;;  %1323 = vmatpush.bf16.msra.mxu2 %v2293_v39  ;;  %v2344_v45 = vld [vmem:[%s2833_s23 + $0xc0] sm:$0xf]  ;;  %v2281_v33 = vor.u32 %v2537_v44, %v2280_v43  ;;  %v2535_v54 = vld [vmem:[%s2833_s23 + $0x34] sm:$0xf0]  ;;  %v2336_v59 = vld [vmem:[%s2833_s23 + $0xb0] sm:$0xf] }
 0x154   : > { %v873_v47 = vmul.f32 %v3004_v34, %v3004_v34  ;;  %v874_v48 = vmul.f32 %v3007_v46, %v3007_v46  ;;  %1352 = vmatpush.bf16.msra.mxu3 %v2357_v42  ;;  %v2273_v60 = vor.u32 %v2535_v54, %v2272_v58  ;;  %v2337_v1 = vor.u32 %v2551_v61, %v2336_v59  ;;  %v2258_v39 = vld [vmem:[%s2833_s23 + $0x18] sm:$0xf0]  ;;  %v2546_v44 = vld [vmem:[%s2833_s23 + $0x94] sm:$0xf]  ;;  %v2250_v58 = vld [vmem:[%s2833_s23 + $0x8] sm:$0xf0] }
 0x155   : > { %v898_v57 = vadd.f32 %v876_v56, %v875_v52  ;;  %1292 = vmatpush.bf16.msra.mxu1 %v2369_v0  ;;  %v2552_v56 = vld [vmem:[%s2833_s23 + $0xc4] sm:$0xf]  ;;  %v2274_v0 = vld [vmem:[%s2833_s23 + $0x38] sm:$0xf0]  ;;  %v2314_v61 = vld [vmem:[%s2833_s23 + $0x88] sm:$0xf0] }
 0x156   : > { %v895_v55 = vadd.f32 %v874_v48, %v873_v47  ;;  %v2553_v47 = vld [vmem:[%s2833_s23 + $0xc4] sm:$0xf0]  ;;  %v2536_v48 = vld [vmem:[%s2833_s23 + $0x44] sm:$0xf]  ;;  %v2277_v2 = vor.u32 %v2534_v62, %v2274_v0 }
 0x157   : > { %1264 = vmatpush.bf16.msra.mxu0 %v2297_v12  ;;  %v2328_v12 = vld [vmem:[%s2833_s23 + $0xa0] sm:$0xf]  ;;  %v2544_v54 = vld [vmem:[%s2833_s23 + $0x84] sm:$0xf] }
 0x158   : > { %896 = vadd.xlane.f32.xlu2 %v895_v55  ;;  %890 = vadd.xlane.f32.xlu0 %v889_v51  ;;  %v2282_v51 = vld [vmem:[%s2833_s23 + $0x48] sm:$0xf0]  ;;  %v2345_v55 = vor.u32 %v2553_v47, %v2344_v45  ;;  %v2329_v17 = vor.u32 %v2549_v14, %v2328_v12  ;;  %v2322_v45 = vld [vmem:[%s2833_s23 + $0x98] sm:$0xf0]  ;;  %v2317_v62 = vor.u32 %v2544_v54, %v2314_v61 }
 0x159   : > { %1293 = vmatpush.bf16.msra.mxu1 %v2361_v16  ;;  %v2285_v52 = vor.u32 %v2536_v48, %v2282_v51  ;;  %v2266_v16 = vld [vmem:[%s2833_s23 + $0x28] sm:$0xf0]  ;;  %v2248_v48 = vld [vmem:[%s2833_s23] sm:$0xf] }
 0x15a   : > { %v2269_v18 = vor.u32 %v2532_v15, %v2266_v16 }
 0x15b   : > { %1265 = vmatpush.bf16.msra.mxu0 %v2289_v30  ;;  %1324 = vmatpush.bf16.msra.mxu2 %v2285_v52  ;;  %v2320_v30 = vld [vmem:[%s2833_s23 + $0x90] sm:$0xf]  ;;  %v2312_v52 = vld [vmem:[%s2833_s23 + $0x80] sm:$0xf] }
 0x15c   : > { %v2321_v42 = vor.u32 %v2547_v35, %v2320_v30 }
 0x15d   : > { %1294 = vmatpush.bf16.msra.mxu1 %v2353_v38  ;;  %v2530_v38 = vld [vmem:[%s2833_s23 + $0x14] sm:$0xf] }
 0x15e   : > { %v2261_v43 = vor.u32 %v2530_v38, %v2258_v39 }
 0x15f   : > { %1266 = vmatpush.bf16.msra.mxu0 %v2281_v33  ;;  %1325 = vmatpush.bf16.msra.mxu2 %v2277_v2  ;;  %v2325_v33 = vor.u32 %v2546_v44, %v2322_v45  ;;  %v1013_v45 = vld [vmem:[%s3608_s19] sm:$0x3] }
 0x160   : > { %899 = vadd.xlane.f32.xlu0 %v898_v57  ;;  %v2346_v57 = vld [vmem:[%s2833_s23 + $0xc8] sm:$0xf0] }
 0x161   : > { %v2349_v53 = vor.u32 %v2552_v56, %v2346_v57  ;;  %1295 = vmatpush.bf16.msra.mxu1 %v2345_v55  ;;  %v2529_v55 = vld [vmem:[%s2833_s23 + $0x4] sm:$0xf0] }
 0x162   : > { %v2545_v56 = vld [vmem:[%s2833_s23 + $0x84] sm:$0xf0]  ;;  %v2249_v57 = vor.u32 %v2529_v55, %v2248_v48  ;;  %v1035_v55 = vld [vmem:[%s537_s20] sm:$0x3] }
 0x163   : > { %1353 = vmatpush.bf16.msra.mxu3 %v2349_v53  ;;  %1267 = vmatpush.bf16.msra.mxu0 %v2273_v60  ;;  %v2528_v53 = vld [vmem:[%s2833_s23 + $0x4] sm:$0xf]  ;;  %v2313_v59 = vor.u32 %v2545_v56, %v2312_v52  ;;  %v3127_v56 = vperm.slane %v1013_v45, 0 }
 0x164   : > { %1326 = vmatpush.bf16.msra.mxu2 %v2269_v18  ;;  %v2253_v60 = vor.u32 %v2528_v53, %v2250_v58  ;;  %v3130_v53 = vperm.slane %v1013_v45, 1 }
 0x165   : > { %1296 = vmatpush.bf16.msra.mxu1 %v2337_v1 }
 0x167   : > { %1354 = vmatpush.bf16.msra.mxu3 %v2341_v9  ;;  %1268 = vmatpush.bf16.msra.mxu0 %v2265_v13 }
 0x168   : > { %1327 = vmatpush.bf16.msra.mxu2 %v2261_v43 }
 0x169   : > { %1297 = vmatpush.bf16.msra.mxu1 %v2329_v17 }
 0x16b   : > { %1355 = vmatpush.bf16.msra.mxu3 %v2333_v21  ;;  %1269 = vmatpush.bf16.msra.mxu0 %v2257_v32 }
 0x16c   : > { %1328 = vmatpush.bf16.msra.mxu2 %v2253_v60  ;;  %v3133_v60 = vperm.slane %v1035_v55, 0 }
 0x16d   : > { %1298 = vmatpush.bf16.msra.mxu1 %v2321_v42 }
 0x16f   : > { %1356 = vmatpush.bf16.msra.mxu3 %v2325_v33  ;;  %1270 = vmatpush.bf16.msra.mxu0 %v2249_v57 }
 0x171   : > { %1299 = vmatpush.bf16.msra.mxu1 %v2313_v59 }
 0x173   : > { %1357 = vmatpush.bf16.msra.mxu3 %v2317_v62 }
 0x1b9   : > { %v885_v40 = vpop.xlane.xlu1 %884 }
 0x1ba   : > { %v903_v51 = vmul.f32 %v885_v40, %v2943_v63 }
 0x1bb   : > { %v879_v31 = vpop.xlane.xlu2 %878 }
 0x1bc   : > { %v901_v41 = vmul.f32 %v879_v31, %v2943_v63  ;;  %v3089_v0 = vadd.f32 1e-05, %v903_v51 }
 0x1be   : > { %v909_v47 = vadd.f32 1e-05, %v901_v41  ;;  %vm943_vm9 = vweird.f32 %v3089_v0 }
 0x1c0   : > { %2664 = vrsqrt.f32 %v909_v47  ;;  %vm923_vm4 = vweird.f32 %v909_v47 }
 0x1c1   : > { %2666 = vrsqrt.f32 %v3089_v0 }
 0x1c2   : > { %v894_v14 = vpop.xlane.xlu1 %893 }
 0x1c3   : > { %v888_v1 = vpop.xlane.xlu2 %887  ;;  %v882_v3 = vpop.xlane.xlu0 %881  ;;  %v906_v20 = vmul.f32 %v894_v14, %v2943_v63 }
 0x1c4   : > { %v904_v2 = vmul.f32 %v888_v1, %v2943_v63  ;;  %v902_v4 = vmul.f32 %v882_v3, %v2943_v63 }
 0x1c5   : > { %v3109_v38 = vadd.f32 1e-05, %v906_v20 }
 0x1c6   : > { %v3093_v9 = vadd.f32 1e-05, %v904_v2  ;;  %v2665_v10 = vpop.eup %2664  ;;  %v910_v11 = vadd.f32 1e-05, %v902_v4  ;;  %v3139_v2 = vperm.slane %v1035_v55, 1 }
 0x1c7   : > { %v918_v12 = vmul.f32 %v2665_v10, %v909_v47  ;;  %v3097_v17 = vpop.eup %2666  ;;  %vm924_vm3 = vweird.f32 %v2665_v10  ;;  %vm973_vm1 = vweird.f32 %v3109_v38 }
 0x1c8   : > { %2668 = vrsqrt.f32 %v3093_v9  ;;  %v938_v29 = vmul.f32 %v3097_v17, %v3089_v0  ;;  %vm925_vm5 = vmor %vm923_vm4, %vm924_vm3  ;;  %vm933_vm7 = vweird.f32 %v910_v11  ;;  %vm953_vm10 = vweird.f32 %v3093_v9 }
 0x1c9   : > { %v919_v13 = vmul.f32 %v2665_v10, %v918_v12  ;;  %2670 = vrsqrt.f32 %v910_v11  ;;  %vm944_vm12 = vweird.f32 %v3097_v17 }
 0x1ca   : > { %v939_v42 = vmul.f32 %v3097_v17, %v938_v29  ;;  %vm945_vm14 = vmor %vm943_vm9, %vm944_vm12 }
 0x1cb   : > { %v920_v15 = vmul.f32 0.5, %v919_v13  ;;  %v891_v16 = vpop.xlane.xlu0 %890  ;;  %v897_v48 = vpop.xlane.xlu2 %896 }
 0x1cc   : > { %v905_v18 = vmul.f32 %v891_v16, %v2943_v63  ;;  %v940_v58 = vmul.f32 0.5, %v939_v42  ;;  %v907_v59 = vmul.f32 %v897_v48, %v2943_v63 }
 0x1cd   : > { %v921_v19 = vsub.f32 1.5, %v920_v15 }
 0x1ce   : > { %v3101_v21 = vpop.eup %2668  ;;  %v3107_v35 = vadd.f32 1e-05, %v905_v18  ;;  %v3150_v12 = vadd.f32 1e-05, %v907_v59 }
 0x1cf   : > { %v2671_v28 = vpop.eup %2670  ;;  %v948_v30 = vmul.f32 %v3101_v21, %v3093_v9  ;;  %v922_v31 = vmul.f32 %v2665_v10, %v921_v19  ;;  %vm954_vm11 = vweird.f32 %v3101_v21 }
 0x1d0   : > { %v928_v32 = vmul.f32 %v2671_v28, %v910_v11  ;;  %2672 = vrsqrt.f32 %v3107_v35  ;;  %vm934_vm6 = vweird.f32 %v2671_v28  ;;  %v941_v11 = vsub.f32 1.5, %v940_v58  ;;  %vm955_vm13 = vmor %vm953_vm10, %vm954_vm11 }
 0x1d1   : > { %v949_v39 = vmul.f32 %v3101_v21, %v948_v30  ;;  %v926_v44 = vsel %vm925_vm5, %v2665_v10, %v922_v31  ;;  %2674 = vrsqrt.f32 %v3109_v38  ;;  %vm935_vm8 = vmor %vm933_vm7, %vm934_vm6  ;;  %vm963_vm15 = vweird.f32 %v3107_v35 }
 0x1d2   : > { %v929_v40 = vmul.f32 %v2671_v28, %v928_v32  ;;  %v997_v52 = vmul.f32 %v926_v44, %v2951_v7  ;;  %v998_v57 = vmul.f32 %v926_v44, %v2953_v8  ;;  %v942_v20 = vmul.f32 %v3097_v17, %v941_v11 }
 0x1d3   : > { %v900_v41 = vpop.xlane.xlu0 %899  ;;  %v950_v33 = vmul.f32 0.5, %v949_v39 }
 0x1d4   : > { %v930_v43 = vmul.f32 0.5, %v929_v40  ;;  %v908_v51 = vmul.f32 %v900_v41, %v2943_v63  ;;  %v1019_v4 = vmul.f32 %v3127_v56, %v997_v52  ;;  %v1020_v63 = vmul.f32 %v3130_v53, %v998_v57 }
 0x1d5   : > { %v951_v62 = vsub.f32 1.5, %v950_v33  ;;  %v946_v40 = vsel %vm945_vm14, %v3097_v17, %v942_v20  ;;  %v2496_v20 = vld [vmem:[%s2842_s29 + $0xf0] sm:$0xf] }
 0x1d6   : > { %v931_v47 = vsub.f32 1.5, %v930_v43  ;;  %v3135_v61 = vpop.eup %2672  ;;  %v3137_v1 = vadd.f32 1e-05, %v908_v51  ;;  %v1041_v9 = vadd.f32 %v3133_v60, %v1019_v4  ;;  %v1042_v18 = vadd.f32 %v3139_v2, %v1020_v63 }
 0x1d7   : > { %v3141_v3 = vpop.eup %2674  ;;  %v958_v13 = vmul.f32 %v3135_v61, %v3107_v35  ;;  %v952_v15 = vmul.f32 %v3101_v21, %v951_v62  ;;  %v1002_v33 = vmul.f32 %v946_v40, %v2949_v6  ;;  %vm964_vm0 = vweird.f32 %v3135_v61 }
 0x1d8   : > { %v932_v54 = vmul.f32 %v2671_v28, %v931_v47  ;;  %2676 = vrsqrt.f32 %v3137_v1  ;;  %vm974_vm2 = vweird.f32 %v3141_v3  ;;  %vm965_vm3 = vmor %vm963_vm15, %vm964_vm0  ;;  %vm993_vm5 = vweird.f32 %v3137_v1 }
 0x1d9   : > { %2678 = vrsqrt.f32 %v3150_v12  ;;  %v956_v32 = vsel %vm955_vm13, %v3101_v21, %v952_v15  ;;  %v1001_v21 = vmul.f32 %v946_v40, %v2947_v5  ;;  %v1024_v5 = vmul.f32 %v3130_v53, %v1002_v33  ;;  %vm975_vm4 = vmor %vm973_vm1, %vm974_vm2  ;;  %v2498_v15 = vld [vmem:[%s2842_s29 + $0xf8] sm:$0xf0]  ;;  %v2570_v33 = vld [vmem:[%s2842_s29 + $0x54] sm:$0xf] }
 0x1da   : > { %v936_v7 = vsel %vm935_vm8, %v2671_v28, %v932_v54  ;;  %v959_v28 = vmul.f32 %v3135_v61, %v958_v13  ;;  %v1003_v41 = vmul.f32 %v956_v32, %v2971_v24  ;;  %v1004_v42 = vmul.f32 %v956_v32, %v2973_v25  ;;  %v2574_v13 = vld [vmem:[%s2842_s29 + $0x74] sm:$0xf]  ;;  %v2490_v32 = vld [vmem:[%s2842_s29 + $0xe8] sm:$0xf0] }
 0x1db   : > { %v999_v8 = vmul.f32 %v936_v7, %v2975_v26  ;;  %v1000_v10 = vmul.f32 %v936_v7, %v2977_v27  ;;  %v968_v27 = vmul.f32 %v3141_v3, %v3109_v38  ;;  %v1023_v55 = vmul.f32 %v3127_v56, %v1001_v21  ;;  %v2589_v21 = vld [vmem:[%s2842_s29 + $0xe4] sm:$0xf0] }
 0x1dc   : > { %v960_v0 = vmul.f32 0.5, %v959_v28  ;;  %v1025_v48 = vmul.f32 %v3127_v56, %v1003_v41  ;;  %v1026_v17 = vmul.f32 %v3130_v53, %v1004_v42  ;;  %v1046_v38 = vadd.f32 %v3139_v2, %v1024_v5  ;;  %v2572_v28 = vld [vmem:[%s2842_s29 + $0x64] sm:$0xf]  ;;  %v2424_v41 = vld [vmem:[%s2842_s29 + $0x60] sm:$0xf] }
 0x1dd   : > { %v1021_v26 = vmul.f32 %v3127_v56, %v999_v8  ;;  %v1022_v14 = vmul.f32 %v3130_v53, %v1000_v10  ;;  %v969_v31 = vmul.f32 %v3141_v3, %v968_v27  ;;  %v1045_v59 = vadd.f32 %v3133_v60, %v1023_v55  ;;  %v2573_v42 = vld [vmem:[%s2842_s29 + $0x64] sm:$0xf0] }
 0x1de   : > { %v3172_v39 = vpop.eup %2676  ;;  %v961_v47 = vsub.f32 1.5, %v960_v0  ;;  %v1047_v52 = vadd.f32 %v3133_v60, %v1025_v48  ;;  %v1048_v57 = vadd.f32 %v3139_v2, %v1026_v17  ;;  %vm983_vm8 = vweird.f32 %v3150_v12 }
 0x1df   : > { %v1043_v16 = vadd.f32 %v3133_v60, %v1021_v26  ;;  %v1044_v19 = vadd.f32 %v3139_v2, %v1022_v14  ;;  %v970_v43 = vmul.f32 0.5, %v969_v31  ;;  %v3177_v44 = vpop.eup %2678  ;;  %v988_v45 = vmul.f32 %v3172_v39, %v3137_v1  ;;  %v2434_v26 = vld [vmem:[%s2842_s29 + $0x78] sm:$0xf0]  ;;  %v2588_v31 = vld [vmem:[%s2842_s29 + $0xe4] sm:$0xf] }
 0x1e0   : > { %v978_v24 = vmul.f32 %v3177_v44, %v3150_v12  ;;  %v962_v6 = vmul.f32 %v3135_v61, %v961_v47  ;;  %v1059_v62 = vpack.c.bf16 %v1047_v52, %v1045_v59  ;;  %v1060_v7 = vpack.c.bf16 %v1048_v57, %v1046_v38  ;;  %v2418_v47 = vld [vmem:[%s2842_s29 + $0x58] sm:$0xf0]  ;;  %v2480_v52 = vld [vmem:[%s2842_s29 + $0xd0] sm:$0xf]  ;;  %v2587_v57 = vld [vmem:[%s2842_s29 + $0xd4] sm:$0xf0] }
 0x1e1   : > { %v1057_v29 = vpack.c.bf16 %v1043_v16, %v1041_v9  ;;  %v1058_v30 = vpack.c.bf16 %v1044_v19, %v1042_v18  ;;  %v971_v51 = vsub.f32 1.5, %v970_v43  ;;  %v989_v25 = vmul.f32 %v3172_v39, %v988_v45  ;;  %v2432_v9 = vld [vmem:[%s2842_s29 + $0x70] sm:$0xf]  ;;  %v2575_v16 = vld [vmem:[%s2842_s29 + $0x74] sm:$0xf0] }
 0x1e2   : > { %v979_v58 = vmul.f32 %v3177_v44, %v978_v24  ;;  %v966_v8 = vsel %vm965_vm3, %v3135_v61, %v962_v6  ;;  %v2590_v61 = vld [vmem:[%s2842_s29 + $0xf4] sm:$0xf]  ;;  %v2437_v27 = vor.u32 %v2574_v13, %v2434_v26  ;;  %v2433_v19 = vor.u32 %v2575_v16, %v2432_v9  ;;  %v2482_v24 = vld [vmem:[%s2842_s29 + $0xd8] sm:$0xf0]  ;;  %v2571_v6 = vld [vmem:[%s2842_s29 + $0x54] sm:$0xf0] }
 0x1e3   : > { %1271 = vmatmul.bf16.vlgmr.msra.gmra.mxu0 %v1057_v29  ;;  %1300 = vmatmul.bf16.vlgmr.msra.gmra.mxu1 %v1058_v30  ;;  %v972_v35 = vmul.f32 %v3141_v3, %v971_v51  ;;  %v3199_v54 = vmul.f32 0.5, %v989_v25  ;;  %v1005_v11 = vmul.f32 %v966_v8, %v2992_v36  ;;  %v1006_v14 = vmul.f32 %v966_v8, %v2995_v37  ;;  %v2591_v36 = vld [vmem:[%s2842_s29 + $0xf4] sm:$0xf0]  ;;  %v2586_v51 = vld [vmem:[%s2842_s29 + $0xd4] sm:$0xf] }
 0x1e4   : > { %1329 = vmatmul.bf16.vlgmr.msra.gmra.mxu2 %v1057_v29  ;;  %1358 = vmatmul.bf16.vlgmr.msra.gmra.mxu3 %v1058_v30  ;;  %v3204_v4 = vmul.f32 0.5, %v979_v58  ;;  %v2501_v18 = vor.u32 %v2590_v61, %v2498_v15  ;;  %v2497_v37 = vor.u32 %v2591_v36, %v2496_v20  ;;  %v2426_v30 = vld [vmem:[%s2842_s29 + $0x68] sm:$0xf0]  ;;  %v2493_v0 = vor.u32 %v2588_v31, %v2490_v32  ;;  %v2416_v25 = vld [vmem:[%s2842_s29 + $0x50] sm:$0xf] }
 0x1e5   : > { %v991_v10 = vsub.f32 1.5, %v3199_v54  ;;  %v976_v63 = vsel %vm975_vm4, %v3141_v3, %v972_v35  ;;  %1659 = vmatpush.bf16.msrb.mxu2 %v2437_v27  ;;  %1601 = vmatpush.bf16.msrb.mxu0 %v2433_v19  ;;  %v2429_v40 = vor.u32 %v2572_v28, %v2426_v30  ;;  %v1028_v43 = vmul.f32 %v3130_v53, %v1006_v14  ;;  %v2474_v1 = vld [vmem:[%s2842_s29 + $0xc8] sm:$0xf0]  ;;  %v2408_v13 = vld [vmem:[%s2842_s29 + $0x40] sm:$0xf] }
 0x1e6   : > { %v1007_v3 = vmul.f32 %v976_v63, %v2967_v22  ;;  %v1008_v29 = vmul.f32 %v976_v63, %v2969_v23  ;;  %v1027_v22 = vmul.f32 %v3127_v56, %v1005_v11  ;;  %1688 = vmatpush.bf16.msrb.mxu3 %v2501_v18  ;;  %v2488_v23 = vld [vmem:[%s2842_s29 + $0xe0] sm:$0xf]  ;;  %1630 = vmatpush.bf16.msrb.mxu1 %v2497_v37  ;;  %vm994_vm6 = vweird.f32 %v3172_v39  ;;  %v2410_v63 = vld [vmem:[%s2842_s29 + $0x48] sm:$0xf0]  ;;  %v2584_v11 = vld [vmem:[%s2842_s29 + $0xc4] sm:$0xf] }
 0x1e7   : > { %v2425_v45 = vor.u32 %v2573_v42, %v2424_v41  ;;  %v2489_v17 = vor.u32 %v2589_v21, %v2488_v23  ;;  %v2421_v5 = vor.u32 %v2570_v33, %v2418_v47  ;;  %v981_v35 = vsub.f32 1.5, %v3204_v4  ;;  %vm3249_vm7 = vmor %vm993_vm5, %vm994_vm6  ;;  %v2568_v4 = vld [vmem:[%s2842_s29 + $0x44] sm:$0xf]  ;;  %v2569_v61 = vld [vmem:[%s2842_s29 + $0x44] sm:$0xf0] }
 0x1e8   : > { %v1029_v48 = vmul.f32 %v3127_v56, %v1007_v3  ;;  %v1030_v55 = vmul.f32 %v3130_v53, %v1008_v29  ;;  %v1049_v58 = vadd.f32 %v3133_v60, %v1027_v22  ;;  %v2485_v54 = vor.u32 %v2586_v51, %v2482_v24  ;;  %v2472_v14 = vld [vmem:[%s2842_s29 + $0xc0] sm:$0xf]  ;;  %v2585_v27 = vld [vmem:[%s2842_s29 + $0xc4] sm:$0xf0]  ;;  %v2566_v36 = vld [vmem:[%s2842_s29 + $0x34] sm:$0xf] }
 0x1e9   : > { %1660 = vmatpush.bf16.msrb.mxu2 %v2429_v40  ;;  %1602 = vmatpush.bf16.msrb.mxu0 %v2425_v45  ;;  %v2417_v59 = vor.u32 %v2571_v6, %v2416_v25  ;;  %v992_v38 = vmul.f32 %v3172_v39, %v991_v10  ;;  %v2481_v8 = vor.u32 %v2587_v57, %v2480_v52  ;;  %vm984_vm9 = vweird.f32 %v3177_v44  ;;  %v2402_v28 = vld [vmem:[%s2842_s29 + $0x38] sm:$0xf0]  ;;  %v2582_v12 = vld [vmem:[%s2842_s29 + $0xb4] sm:$0xf]  ;;  %v2400_v31 = vld [vmem:[%s2842_s29 + $0x30] sm:$0xf] }
 0x1ea   : > { %1689 = vmatpush.bf16.msrb.mxu3 %v2493_v0  ;;  %1631 = vmatpush.bf16.msrb.mxu1 %v2489_v17  ;;  %v1051_v10 = vadd.f32 %v3133_v60, %v1029_v48  ;;  %v1052_v26 = vadd.f32 %v3139_v2, %v1030_v55  ;;  %v982_v15 = vmul.f32 %v3177_v44, %v981_v35  ;;  %vm3269_vm10 = vmor %vm983_vm8, %vm984_vm9  ;;  %v2466_v30 = vld [vmem:[%s2842_s29 + $0xb8] sm:$0xf0]  ;;  %v2567_v32 = vld [vmem:[%s2842_s29 + $0x34] sm:$0xf0] }
 0x1eb   : > { %v996_v18 = vsel %vm3249_vm7, %v3172_v39, %v992_v38  ;;  %v2413_v19 = vor.u32 %v2568_v4, %v2410_v63  ;;  %v2477_v20 = vor.u32 %v2584_v11, %v2474_v1  ;;  %v2409_v29 = vor.u32 %v2569_v61, %v2408_v13  ;;  %v2464_v22 = vld [vmem:[%s2842_s29 + $0xb0] sm:$0xf]  ;;  %v2583_v40 = vld [vmem:[%s2842_s29 + $0xb4] sm:$0xf0]  ;;  %v2394_v33 = vld [vmem:[%s2842_s29 + $0x28] sm:$0xf0] }
 0x1ec   : > { %v1061_v9 = vpack.c.bf16 %v1051_v10, %v1049_v58  ;;  %v2473_v37 = vor.u32 %v2585_v27, %v2472_v14  ;;  %v986_v39 = vsel %vm3269_vm10, %v3177_v44, %v982_v15  ;;  %v1011_v0 = vmul.f32 %v996_v18, %v3014_v49  ;;  %v2580_v47 = vld [vmem:[%s2842_s29 + $0xa4] sm:$0xf]  ;;  %v2458_v48 = vld [vmem:[%s2842_s29 + $0xa8] sm:$0xf0]  ;;  %v2456_v35 = vld [vmem:[%s2842_s29 + $0xa0] sm:$0xf] }
 0x1ed   : > { %1661 = vmatpush.bf16.msrb.mxu2 %v2421_v5  ;;  %1603 = vmatpush.bf16.msrb.mxu0 %v2417_v59  ;;  %v1012_v41 = vmul.f32 %v996_v18, %v3017_v50  ;;  %v2405_v42 = vor.u32 %v2566_v36, %v2402_v28  ;;  %v2469_v23 = vor.u32 %v2582_v12, %v2466_v30  ;;  %v2384_v4 = vld [vmem:[%s2842_s29 + $0x10] sm:$0xf]  ;;  %v2563_v63 = vld [vmem:[%s2842_s29 + $0x14] sm:$0xf0]  ;;  %v2560_v13 = vld [vmem:[%s2842_s29 + $0x4] sm:$0xf] }
 0x1ee   : > { %1690 = vmatpush.bf16.msrb.mxu3 %v2485_v54  ;;  %1632 = vmatpush.bf16.msrb.mxu1 %v2481_v8  ;;  %v2401_v45 = vor.u32 %v2567_v32, %v2400_v31  ;;  %v2465_v21 = vor.u32 %v2583_v40, %v2464_v22  ;;  %v1009_v17 = vmul.f32 %v986_v39, %v3004_v34  ;;  %v2581_v54 = vld [vmem:[%s2842_s29 + $0xa4] sm:$0xf0]  ;;  %v2448_v11 = vld [vmem:[%s2842_s29 + $0x90] sm:$0xf]  ;;  %v2579_v1 = vld [vmem:[%s2842_s29 + $0x94] sm:$0xf0] }
 0x1ef   : > { %v1010_v44 = vmul.f32 %v986_v39, %v3007_v46  ;;  %v1033_v49 = vmul.f32 %v3127_v56, %v1011_v0  ;;  %v1034_v50 = vmul.f32 %v3130_v53, %v1012_v41  ;;  %v2461_v24 = vor.u32 %v2580_v47, %v2458_v48  ;;  %v2378_v61 = vld [vmem:[%s2842_s29 + $0x8] sm:$0xf0]  ;;  %v2376_v27 = vld [vmem:[%s2842_s29] sm:$0xf]  ;;  %v2561_v15 = vld [vmem:[%s2842_s29 + $0x4] sm:$0xf0] }
 0x1f0   : > { %v1031_v25 = vmul.f32 %v3127_v56, %v1009_v17  ;;  %v2392_v56 = vld [vmem:[%s2842_s29 + $0x20] sm:$0xf]  ;;  %v2457_v59 = vor.u32 %v2581_v54, %v2456_v35  ;;  %v2385_v10 = vor.u32 %v2563_v63, %v2384_v4  ;;  %v2381_v14 = vor.u32 %v2560_v13, %v2378_v61  ;;  %v2576_v16 = vld [vmem:[%s2842_s29 + $0x84] sm:$0xf] }
 0x1f1   : > { %1662 = vmatpush.bf16.msrb.mxu2 %v2413_v19  ;;  %1604 = vmatpush.bf16.msrb.mxu0 %v2409_v29  ;;  %v1032_v55 = vmul.f32 %v3130_v53, %v1010_v44  ;;  %v1055_v34 = vadd.f32 %v3133_v60, %v1033_v49  ;;  %v1056_v46 = vadd.f32 %v3139_v2, %v1034_v50  ;;  %v2565_v53 = vld [vmem:[%s2842_s29 + $0x24] sm:$0xf0]  ;;  %v2440_v18 = vld [vmem:[%s2842_s29 + $0x80] sm:$0xf] }
 0x1f2   : > { %1691 = vmatpush.bf16.msrb.mxu3 %v2477_v20  ;;  %1633 = vmatpush.bf16.msrb.mxu1 %v2473_v37  ;;  %v1053_v5 = vadd.f32 %v3133_v60, %v1031_v25  ;;  %v2393_v58 = vor.u32 %v2565_v53, %v2392_v56  ;;  %v2562_v60 = vld [vmem:[%s2842_s29 + $0x14] sm:$0xf]  ;;  %v2577_v20 = vld [vmem:[%s2842_s29 + $0x84] sm:$0xf0]  ;;  %v1097_v28 = vld [vmem:[%s546_s26] sm:$0x3] }
 0x1f3   : > { %1276 = vmatmul.bf16.gmra.mxu0 %v1059_v62  ;;  %1305 = vmatmul.bf16.gmra.mxu1 %v1060_v7  ;;  %v1054_v6 = vadd.f32 %v3139_v2, %v1032_v55  ;;  %v2441_v36 = vor.u32 %v2577_v20, %v2440_v18  ;;  %v3328_v12 = vperm.slane %v1097_v28, 0  ;;  %v3331_v22 = vperm.slane %v1097_v28, 1 }
 0x1f4   : > { %1334 = vmatmul.bf16.gmra.mxu2 %v1059_v62  ;;  %1363 = vmatmul.bf16.gmra.mxu3 %v1060_v7  ;;  %v1050_v7 = vadd.f32 %v3139_v2, %v1028_v43  ;;  %v2564_v43 = vld [vmem:[%s2842_s29 + $0x24] sm:$0xf]  ;;  %v1063_v52 = vpack.c.bf16 %v1055_v34, %v1053_v5  ;;  %v2386_v2 = vld [vmem:[%s2842_s29 + $0x18] sm:$0xf0]  ;;  %v2578_v62 = vld [vmem:[%s2842_s29 + $0x94] sm:$0xf] }
 0x1f5   : > { %1663 = vmatpush.bf16.msrb.mxu2 %v2405_v42  ;;  %v2397_v51 = vor.u32 %v2564_v43, %v2394_v33  ;;  %1605 = vmatpush.bf16.msrb.mxu0 %v2401_v45  ;;  %v1064_v57 = vpack.c.bf16 %v1056_v46, %v1054_v6  ;;  %v2389_v38 = vor.u32 %v2562_v60, %v2386_v2 }
 0x1f6   : > { %v1062_v3 = vpack.c.bf16 %v1052_v26, %v1050_v7  ;;  %1692 = vmatpush.bf16.msrb.mxu3 %v2469_v23  ;;  %1634 = vmatpush.bf16.msrb.mxu1 %v2465_v21  ;;  %v2450_v7 = vld [vmem:[%s2842_s29 + $0x98] sm:$0xf0]  ;;  %v2449_v26 = vor.u32 %v2579_v1, %v2448_v11 }
 0x1f7   : > { %v2453_v8 = vor.u32 %v2578_v62, %v2450_v7 }
 0x1f9   : > { %1664 = vmatpush.bf16.msrb.mxu2 %v2397_v51  ;;  %1606 = vmatpush.bf16.msrb.mxu0 %v2393_v58 }
 0x1fa   : > { %1693 = vmatpush.bf16.msrb.mxu3 %v2461_v24  ;;  %1635 = vmatpush.bf16.msrb.mxu1 %v2457_v59 }
 0x1fd   : > { %1665 = vmatpush.bf16.msrb.mxu2 %v2389_v38  ;;  %1607 = vmatpush.bf16.msrb.mxu0 %v2385_v10 }
 0x1fe   : > { %1694 = vmatpush.bf16.msrb.mxu3 %v2453_v8  ;;  %1636 = vmatpush.bf16.msrb.mxu1 %v2449_v26 }
 0x201   : > { %1666 = vmatpush.bf16.msrb.mxu2 %v2381_v14 }
 0x202   : > { %1637 = vmatpush.bf16.msrb.mxu1 %v2441_v36 }
 0x203   : > { %1281 = vmatmul.bf16.gmra.mxu0 %v1061_v9  ;;  %1310 = vmatmul.bf16.gmra.mxu1 %v1062_v3 }
 0x204   : > { %1339 = vmatmul.bf16.gmra.mxu2 %v1061_v9  ;;  %1368 = vmatmul.bf16.gmra.mxu3 %v1062_v3  ;;  %v2377_v9 = vor.u32 %v2561_v15, %v2376_v27  ;;  %v2442_v3 = vld [vmem:[%s2842_s29 + $0x88] sm:$0xf0] }
 0x205   : > { %v2445_v19 = vor.u32 %v2576_v16, %v2442_v3 }
 0x206   : > { %1608 = vmatpush.bf16.msrb.mxu0 %v2377_v9 }
 0x207   : > { %1695 = vmatpush.bf16.msrb.mxu3 %v2445_v19 }
 0x213   : > { %1286 = vmatmul.bf16.gmra.mxu0 %v1063_v52  ;;  %1315 = vmatmul.bf16.gmra.mxu1 %v1064_v57 }
 0x214   : > { %1344 = vmatmul.bf16.gmra.mxu2 %v1063_v52  ;;  %1373 = vmatmul.bf16.gmra.mxu3 %v1064_v57 }
 0x260   : > { %v1272_v29 = vpop.f32.mrf.mxu0  ;;  %v1301_v37 = vpop.f32.mrf.mxu1 }
 0x261   : > { %v1273_v30 = vadd.f32 %v1272_v29, %v3328_v12 }
 0x263   : > { %v1302_v0 = vadd.f32 %v1301_v37, %v1273_v30 }
 0x265   : > { %v1379_v43 = vmax.f32 %v1302_v0, 0.0 }
 0x267   : > { %v1330_v31 = vpop.f32.mrf.mxu2  ;;  %v1359_v32 = vpop.f32.mrf.mxu3 }
 0x268   : > { %v1274_v40 = vpop.f32.mrf.mxu0  ;;  %v1303_v39 = vpop.f32.mrf.mxu1  ;;  %v1331_v23 = vadd.f32 %v1330_v31, %v3331_v22 }
 0x269   : > { %v1275_v41 = vadd.f32 %v1274_v40, %v3328_v12 }
 0x26a   : > { %v1360_v48 = vadd.f32 %v1359_v32, %v1331_v23 }
 0x26b   : > { %v1304_v42 = vadd.f32 %v1303_v39, %v1275_v41 }
 0x26c   : > { %v1380_v51 = vmax.f32 %v1360_v48, 0.0 }
 0x26d   : > { %v1381_v45 = vmax.f32 %v1304_v42, 0.0 }
 0x26f   : > { %v1395_v21 = vpack.c.bf16 %v1381_v45, %v1379_v43  ;;  %v1332_v33 = vpop.f32.mrf.mxu2  ;;  %v1361_v47 = vpop.f32.mrf.mxu3 }
 0x270   : > { %v1333_v17 = vadd.f32 %v1332_v33, %v3331_v22  ;;  %v1277_v44 = vpop.f32.mrf.mxu0  ;;  %v1306_v49 = vpop.f32.mrf.mxu1 }
 0x271   : > { %1609 = vmatmul.bf16.vlgmr.msrb.gmra.mxu0 %v1395_v21  ;;  %1667 = vmatmul.bf16.vlgmr.msrb.gmra.mxu2 %v1395_v21  ;;  %v1278_v25 = vadd.f32 %v1277_v44, %v3328_v12 }
 0x272   : > { %v1362_v50 = vadd.f32 %v1361_v47, %v1333_v17 }
 0x273   : > { %v1307_v52 = vadd.f32 %v1306_v49, %v1278_v25 }
 0x274   : > { %v1382_v24 = vmax.f32 %v1362_v50, 0.0 }
 0x275   : > { %v1383_v35 = vmax.f32 %v1307_v52, 0.0 }
 0x276   : > { %v1396_v55 = vpack.c.bf16 %v1382_v24, %v1380_v51 }
 0x277   : > { %v1335_v34 = vpop.f32.mrf.mxu2  ;;  %v1364_v46 = vpop.f32.mrf.mxu3 }
 0x278   : > { %1638 = vmatmul.bf16.vlgmr.msrb.gmra.mxu1 %v1396_v55  ;;  %1696 = vmatmul.bf16.vlgmr.msrb.gmra.mxu3 %v1396_v55  ;;  %v1279_v5 = vpop.f32.mrf.mxu0  ;;  %v1308_v6 = vpop.f32.mrf.mxu1  ;;  %v1336_v53 = vadd.f32 %v1335_v34, %v3331_v22 }
 0x279   : > { %v1280_v57 = vadd.f32 %v1279_v5, %v3328_v12 }
 0x27a   : > { %v1365_v59 = vadd.f32 %v1364_v46, %v1336_v53 }
 0x27b   : > { %v1309_v56 = vadd.f32 %v1308_v6, %v1280_v57 }
 0x27c   : > { %v1384_v4 = vmax.f32 %v1365_v59, 0.0 }
 0x27d   : > { %v1385_v58 = vmax.f32 %v1309_v56, 0.0 }
 0x27f   : > { %v1337_v54 = vpop.f32.mrf.mxu2  ;;  %v1366_v60 = vpop.f32.mrf.mxu3  ;;  %v1397_v2 = vpack.c.bf16 %v1385_v58, %v1383_v35  ;;  %v2680_v35 = vld [vmem:[#allocation2 + $0x30] sm:$0xff] }
 0x280   : > { %v1338_v38 = vadd.f32 %v1337_v54, %v3331_v22  ;;  %v1282_v62 = vpop.f32.mrf.mxu0  ;;  %v1311_v7 = vpop.f32.mrf.mxu1 }
 0x281   : > { %1614 = vmatmul.bf16.gmra.mxu0 %v1397_v2  ;;  %1672 = vmatmul.bf16.gmra.mxu2 %v1397_v2  ;;  %v1283_v10 = vadd.f32 %v1282_v62, %v3328_v12 }
 0x282   : > { %v1367_v8 = vadd.f32 %v1366_v60, %v1338_v38 }
 0x283   : > { %v1312_v14 = vadd.f32 %v1311_v7, %v1283_v10  ;;  %v2681_v7 = vld [vmem:[#allocation2] sm:$0xff]  ;;  %v2682_v10 = vld [vmem:[#allocation2 + $0x58] sm:$0xff] }
 0x284   : > { %v1386_v63 = vmax.f32 %v1367_v8, 0.0 }
 0x285   : > { %v1387_v16 = vmax.f32 %v1312_v14, 0.0 }
 0x286   : > { %v1398_v11 = vpack.c.bf16 %v1386_v63, %v1384_v4 }
 0x287   : > { %v1340_v1 = vpop.f32.mrf.mxu2  ;;  %v1369_v13 = vpop.f32.mrf.mxu3 }
 0x288   : > { %1643 = vmatmul.bf16.gmra.mxu1 %v1398_v11  ;;  %1701 = vmatmul.bf16.gmra.mxu3 %v1398_v11  ;;  %v1284_v26 = vpop.f32.mrf.mxu0  ;;  %v1313_v61 = vpop.f32.mrf.mxu1  ;;  %v1341_v9 = vadd.f32 %v1340_v1, %v3331_v22 }
 0x289   : > { %v1285_v27 = vadd.f32 %v1284_v26, %v3328_v12 }
 0x28a   : > { %v1370_v36 = vadd.f32 %v1369_v13, %v1341_v9 }
 0x28b   : > { %v1314_v15 = vadd.f32 %v1313_v61, %v1285_v27 }
 0x28c   : > { %v1388_v31 = vmax.f32 %v1370_v36, 0.0 }
 0x28d   : > { %v1389_v3 = vmax.f32 %v1314_v15, 0.0  ;;  %v2683_v15 = vld [vmem:[#allocation2 + $0x18] sm:$0xff] }
 0x28f   : > { %v1342_v18 = vpop.f32.mrf.mxu2  ;;  %v1371_v19 = vpop.f32.mrf.mxu3  ;;  %v1399_v20 = vpack.c.bf16 %v1389_v3, %v1387_v16 }
 0x290   : > { %v1343_v28 = vadd.f32 %v1342_v18, %v3331_v22  ;;  %v1287_v29 = vpop.f32.mrf.mxu0  ;;  %v1316_v37 = vpop.f32.mrf.mxu1  ;;  %v2684_v18 = vld [vmem:[#allocation2 + $0x50] sm:$0xff] }
 0x291   : > { %1619 = vmatmul.bf16.gmra.mxu0 %v1399_v20  ;;  %1677 = vmatmul.bf16.gmra.mxu2 %v1399_v20  ;;  %v1288_v40 = vadd.f32 %v1287_v29, %v3328_v12 }
 0x292   : > { %v1372_v30 = vadd.f32 %v1371_v19, %v1343_v28 }
 0x293   : > { %v1317_v23 = vadd.f32 %v1316_v37, %v1288_v40 }
 0x294   : > { %v1390_v32 = vmax.f32 %v1372_v30, 0.0 }
 0x295   : > { %v1391_v47 = vmax.f32 %v1317_v23, 0.0 }
 0x296   : > { %v1400_v39 = vpack.c.bf16 %v1390_v32, %v1388_v31  ;;  %v2685_v31 = vld [vmem:[#allocation2 + $0x68] sm:$0xff] }
 0x297   : > { %v1345_v0 = vpop.f32.mrf.mxu2  ;;  %v1374_v41 = vpop.f32.mrf.mxu3 }
 0x298   : > { %1648 = vmatmul.bf16.gmra.mxu1 %v1400_v39  ;;  %1706 = vmatmul.bf16.gmra.mxu3 %v1400_v39  ;;  %v1289_v42 = vpop.f32.mrf.mxu0  ;;  %v1318_v45 = vpop.f32.mrf.mxu1  ;;  %v1346_v33 = vadd.f32 %v1345_v0, %v3331_v22  ;;  %v2686_v0 = vld [vmem:[#allocation2 + $0x8] sm:$0xff] }
 0x299   : > { %v1290_v43 = vadd.f32 %v1289_v42, %v3328_v12  ;;  %v1435_v12 = vld [vmem:[%s3613_s27] sm:$0x3] }
 0x29a   : > { %v1375_v49 = vadd.f32 %v1374_v41, %v1346_v33  ;;  %v3353_v5 = vperm.slane %v1435_v12, 0  ;;  %v3356_v56 = vperm.slane %v1435_v12, 1 }
 0x29b   : > { %v1319_v21 = vadd.f32 %v1318_v45, %v1290_v43 }
 0x29c   : > { %v1392_v25 = vmax.f32 %v1375_v49, 0.0  ;;  %v2688_v49 = vld [vmem:[#allocation2 + $0x40] sm:$0xff] }
 0x29d   : > { %v1393_v48 = vmax.f32 %v1319_v21, 0.0 }
 0x29f   : > { %v1347_v17 = vpop.f32.mrf.mxu2  ;;  %v1401_v44 = vpack.c.bf16 %v1393_v48, %v1391_v47  ;;  %v1376_v51 = vpop.f32.mrf.mxu3  ;;  %v2687_v47 = vld [vmem:[#allocation2 + $0x48] sm:$0xff] }
 0x2a0   : > { %v1348_v50 = vadd.f32 %v1347_v17, %v3331_v22 }
 0x2a1   : > { %1624 = vmatmul.bf16.gmra.mxu0 %v1401_v44  ;;  %1682 = vmatmul.bf16.gmra.mxu2 %v1401_v44 }
 0x2a2   : > { %v1377_v24 = vadd.f32 %v1376_v51, %v1348_v50 }
 0x2a4   : > { %v1394_v55 = vmax.f32 %v1377_v24, 0.0 }
 0x2a6   : > { %v1402_v34 = vpack.c.bf16 %v1394_v55, %v1392_v25 }
 0x2a8   : > { %1653 = vmatmul.bf16.gmra.mxu1 %v1402_v34  ;;  %1711 = vmatmul.bf16.gmra.mxu3 %v1402_v34 }
 0x2ee   : > { %v1610_v46 = vpop.f32.mrf.mxu0 }
 0x2ef   : > { %v1611_v6 = vadd.f32 %v1610_v46, %v3353_v5  ;;  %v2689_v46 = vld [vmem:[#allocation2 + $0x20] sm:$0xff] }
 0x2f4   : > { %v1668_v22 = vpop.f32.mrf.mxu2 }
 0x2f5   : > { %v1639_v52 = vpop.f32.mrf.mxu1  ;;  %v1669_v54 = vadd.f32 %v1668_v22, %v3356_v56 }
 0x2f6   : > { %v1640_v57 = vadd.f32 %v1639_v52, %v1611_v6  ;;  %v1612_v53 = vpop.f32.mrf.mxu0 }
 0x2f7   : > { %v1613_v2 = vadd.f32 %v1612_v53, %v3353_v5 }
 0x2f8   : > { %v3358_v58 = vadd.f32 %v2680_v35, %v1640_v57  ;;  %v2690_v57 = vld [vmem:[#allocation2 + $0x10] sm:$0xff] }
 0x2fa   : > { %1733 = vst [vmem:[#allocation2 + $0x30] sm:$0xff] %v3358_v58 }
 0x2fb   : > { %v1697_v60 = vpop.f32.mrf.mxu3 }
 0x2fc   : > { %v1698_v59 = vadd.f32 %v1697_v60, %v1669_v54  ;;  %v1670_v38 = vpop.f32.mrf.mxu2 }
 0x2fd   : > { %v1641_v62 = vpop.f32.mrf.mxu1  ;;  %v1671_v1 = vadd.f32 %v1670_v38, %v3356_v56 }
 0x2fe   : > { %v3363_v8 = vadd.f32 %v2681_v7, %v1698_v59  ;;  %v1642_v4 = vadd.f32 %v1641_v62, %v1613_v2  ;;  %v1615_v63 = vpop.f32.mrf.mxu0  ;;  %v2691_v62 = vld [vmem:[#allocation2 + $0x38] sm:$0xff] }
 0x2ff   : > { %v1616_v26 = vadd.f32 %v1615_v63, %v3353_v5  ;;  %v2692_v63 = vld [vmem:[#allocation2 + $0x60] sm:$0xff] }
 0x300   : > { %1734 = vst [vmem:[#allocation2] sm:$0xff] %v3363_v8  ;;  %v3366_v11 = vadd.f32 %v2682_v10, %v1642_v4 }
 0x302   : > { %1735 = vst [vmem:[#allocation2 + $0x58] sm:$0xff] %v3366_v11 }
 0x303   : > { %v1699_v13 = vpop.f32.mrf.mxu3 }
 0x304   : > { %v1700_v61 = vadd.f32 %v1699_v13, %v1671_v1  ;;  %v1673_v14 = vpop.f32.mrf.mxu2 }
 0x305   : > { %v1644_v27 = vpop.f32.mrf.mxu1  ;;  %v1674_v20 = vadd.f32 %v1673_v14, %v3356_v56 }
 0x306   : > { %v3371_v9 = vadd.f32 %v2683_v15, %v1700_v61  ;;  %v1645_v16 = vadd.f32 %v1644_v27, %v1616_v26  ;;  %v1617_v3 = vpop.f32.mrf.mxu0  ;;  %v2693_v15 = vld [vmem:[#allocation2 + $0x70] sm:$0xff] }
 0x307   : > { %v1618_v28 = vadd.f32 %v1617_v3, %v3353_v5 }
 0x308   : > { %1736 = vst [vmem:[#allocation2 + $0x18] sm:$0xff] %v3371_v9  ;;  %v3374_v19 = vadd.f32 %v2684_v18, %v1645_v16 }
 0x30a   : > { %1737 = vst [vmem:[#allocation2 + $0x50] sm:$0xff] %v3374_v19 }
 0x30b   : > { %v1702_v36 = vpop.f32.mrf.mxu3 }
 0x30c   : > { %v1703_v29 = vadd.f32 %v1702_v36, %v1674_v20  ;;  %v1675_v37 = vpop.f32.mrf.mxu2  ;;  %v2694_v20 = vld [vmem:[#allocation2 + $0x78] sm:$0xff] }
 0x30d   : > { %v1646_v30 = vpop.f32.mrf.mxu1  ;;  %v1676_v42 = vadd.f32 %v1675_v37, %v3356_v56 }
 0x30e   : > { %v3379_v32 = vadd.f32 %v2685_v31, %v1703_v29  ;;  %v1647_v40 = vadd.f32 %v1646_v30, %v1618_v28  ;;  %v1620_v39 = vpop.f32.mrf.mxu0  ;;  %v2695_v30 = vld [vmem:[#allocation2 + $0x28] sm:$0xff] }
 0x30f   : > { %v1621_v43 = vadd.f32 %v1620_v39, %v3353_v5 }
 0x310   : > { %1738 = vst [vmem:[#allocation2 + $0x68] sm:$0xff] %v3379_v32  ;;  %v3382_v41 = vadd.f32 %v2686_v0, %v1647_v40 }
 0x312   : > { %1739 = vst [vmem:[#allocation2 + $0x8] sm:$0xff] %v3382_v41 }
 0x313   : > { %v1704_v23 = vpop.f32.mrf.mxu3 }
 0x314   : > { %v1705_v45 = vadd.f32 %v1704_v23, %v1676_v42  ;;  %v1678_v21 = vpop.f32.mrf.mxu2 }
 0x315   : > { %v1649_v33 = vpop.f32.mrf.mxu1  ;;  %v1679_v51 = vadd.f32 %v1678_v21, %v3356_v56 }
 0x316   : > { %v3387_v48 = vadd.f32 %v2687_v47, %v1705_v45  ;;  %v1650_v17 = vadd.f32 %v1649_v33, %v1621_v43  ;;  %v1622_v44 = vpop.f32.mrf.mxu0 }
 0x317   : > { %v1623_v25 = vadd.f32 %v1622_v44, %v3353_v5 }
 0x318   : > { %1740 = vst [vmem:[#allocation2 + $0x48] sm:$0xff] %v3387_v48  ;;  %v3390_v50 = vadd.f32 %v2688_v49, %v1650_v17 }
 0x31a   : > { %1741 = vst [vmem:[#allocation2 + $0x40] sm:$0xff] %v3390_v50 }
 0x31b   : > { %v1707_v24 = vpop.f32.mrf.mxu3 }
 0x31c   : > { %v1708_v55 = vadd.f32 %v1707_v24, %v1679_v51  ;;  %v1680_v34 = vpop.f32.mrf.mxu2 }
 0x31d   : > { %v1651_v12 = vpop.f32.mrf.mxu1  ;;  %v1681_v35 = vadd.f32 %v1680_v34, %v3356_v56 }
 0x31e   : > { %v3395_v6 = vadd.f32 %v2689_v46, %v1708_v55  ;;  %v1652_v22 = vadd.f32 %v1651_v12, %v1623_v25  ;;  %v1625_v52 = vpop.f32.mrf.mxu0 }
 0x31f   : > { %v1626_v60 = vadd.f32 %v1625_v52, %v3353_v5 }
 0x320   : > { %1742 = vst [vmem:[#allocation2 + $0x20] sm:$0xff] %v3395_v6  ;;  %v3398_v53 = vadd.f32 %v2690_v57, %v1652_v22 }
 0x322   : > { %1743 = vst [vmem:[#allocation2 + $0x10] sm:$0xff] %v3398_v53 }
 0x323   : > { %v1709_v54 = vpop.f32.mrf.mxu3 }
 0x324   : > { %v1710_v2 = vadd.f32 %v1709_v54, %v1681_v35  ;;  %v1683_v38 = vpop.f32.mrf.mxu2 }
 0x325   : > { %v1654_v59 = vpop.f32.mrf.mxu1  ;;  %v1684_v13 = vadd.f32 %v1683_v38, %v3356_v56 }
 0x326   : > { %v3403_v7 = vadd.f32 %v2691_v62, %v1710_v2  ;;  %v1655_v4 = vadd.f32 %v1654_v59, %v1626_v60  ;;  %v1627_v1 = vpop.f32.mrf.mxu0 }
 0x327   : > { %v1628_v61 = vadd.f32 %v1627_v1, %v3353_v5 }
 0x328   : > { %1744 = vst [vmem:[#allocation2 + $0x38] sm:$0xff] %v3403_v7  ;;  %v3406_v10 = vadd.f32 %v2692_v63, %v1655_v4 }
 0x32a   : > { %1745 = vst [vmem:[#allocation2 + $0x60] sm:$0xff] %v3406_v10 }
 0x32b   : > { %v1712_v26 = vpop.f32.mrf.mxu3 }
 0x32c   : > { %v1713_v14 = vadd.f32 %v1712_v26, %v1684_v13  ;;  %v1685_v18 = vpop.f32.mrf.mxu2 }
 0x32d   : > { %v1656_v27 = vpop.f32.mrf.mxu1  ;;  %v1686_v28 = vadd.f32 %v1685_v18, %v3356_v56 }
 0x32e   : > { %v3411_v16 = vadd.f32 %v2693_v15, %v1713_v14  ;;  %v1657_v3 = vadd.f32 %v1656_v27, %v1628_v61 }
 0x330   : > { %1746 = vst [vmem:[#allocation2 + $0x70] sm:$0xff] %v3411_v16  ;;  %v3414_v36 = vadd.f32 %v2694_v20, %v1657_v3 }
 0x332   : > { %1747 = vst [vmem:[#allocation2 + $0x78] sm:$0xff] %v3414_v36 }
 0x333   : > { %v1714_v29 = vpop.f32.mrf.mxu3 }
 0x334   : > { %v1715_v37 = vadd.f32 %v1714_v29, %v1686_v28  ;;  %1752 = sbr.rel (%p2502_p6) target bundleno = 1603 (0x643), region = 80 }
 0x336   : > { %v3418_v5 = vadd.f32 %v2695_v30, %v1715_v37 }
 0x338   : > { %1748 = vst [vmem:[#allocation2 + $0x28] sm:$0xff] %v3418_v5 }
 0x339   : > { %v1768_v31 = vld [vmem:[%s3597_s9 + $0x78] sm:$0xff]  ;;  %v1767_v56 = vld [vmem:[%s3597_s9 + $0x70] sm:$0xff]  ;;  %v1766_v0 = vld [vmem:[%s3597_s9 + $0x68] sm:$0xff]  ;;  %vm1881_vm11 = vcmask 1043456   ;;  %vm1868_vm12 = vcmask 31744   ;;  %vm1922_vm13 = vcmask 523264  }
 0x33a   : > { %v1784_v40 = vld [vmem:[%s3597_s9 + $0xf8] sm:$0xff]  ;;  %1785 = vmatpush.msra.mxu0 %v1768_v31  ;;  %v1783_v39 = vld [vmem:[%s3597_s9 + $0xf0] sm:$0xff]  ;;  %v1782_v42 = vld [vmem:[%s3597_s9 + $0xe8] sm:$0xff]  ;;  %2592 = vmatpush.msra.mxu2 %v1768_v31  ;;  %vm1939_vm14 = vcmask 516096  }
 0x33b   : > { %1826 = vmatpush.msra.mxu1 %v1784_v40  ;;  %2608 = vmatpush.msra.mxu3 %v1784_v40  ;;  %v1765_v23 = vld [vmem:[%s3597_s9 + $0x60] sm:$0xff]  ;;  %v1764_v45 = vld [vmem:[%s3597_s9 + $0x58] sm:$0xff]  ;;  %v1763_v33 = vld [vmem:[%s3597_s9 + $0x50] sm:$0xff] }
 0x33c   : > { %1786 = vmatpush.msra.mxu0 %v1767_v56  ;;  %v1781_v43 = vld [vmem:[%s3597_s9 + $0xe0] sm:$0xff]  ;;  %2593 = vmatpush.msra.mxu2 %v1767_v56  ;;  %v1780_v21 = vld [vmem:[%s3597_s9 + $0xd8] sm:$0xff]  ;;  %v1779_v47 = vld [vmem:[%s3597_s9 + $0xd0] sm:$0xff] }
 0x33d   : > { %1827 = vmatpush.msra.mxu1 %v1783_v39  ;;  %2609 = vmatpush.msra.mxu3 %v1783_v39  ;;  %v1762_v17 = vld [vmem:[%s3597_s9 + $0x48] sm:$0xff]  ;;  %v1761_v49 = vld [vmem:[%s3597_s9 + $0x40] sm:$0xff]  ;;  %v1760_v24 = vld [vmem:[%s3597_s9 + $0x38] sm:$0xff] }
 0x33e   : > { %1787 = vmatpush.msra.mxu0 %v1766_v0  ;;  %2594 = vmatpush.msra.mxu2 %v1766_v0  ;;  %v1778_v44 = vld [vmem:[%s3597_s9 + $0xc8] sm:$0xff]  ;;  %v1777_v51 = vld [vmem:[%s3597_s9 + $0xc0] sm:$0xff]  ;;  %v1776_v25 = vld [vmem:[%s3597_s9 + $0xb8] sm:$0xff] }
 0x33f   : > { %1828 = vmatpush.msra.mxu1 %v1782_v42  ;;  %2610 = vmatpush.msra.mxu3 %v1782_v42  ;;  %v1759_v55 = vld [vmem:[%s3597_s9 + $0x30] sm:$0xff]  ;;  %v1758_v12 = vld [vmem:[%s3597_s9 + $0x28] sm:$0xff]  ;;  %v1757_v22 = vld [vmem:[%s3597_s9 + $0x20] sm:$0xff] }
 0x340   : > { %1788 = vmatpush.msra.mxu0 %v1765_v23  ;;  %2595 = vmatpush.msra.mxu2 %v1765_v23  ;;  %v1775_v34 = vld [vmem:[%s3597_s9 + $0xb0] sm:$0xff]  ;;  %v1774_v46 = vld [vmem:[%s3597_s9 + $0xa8] sm:$0xff]  ;;  %v1773_v52 = vld [vmem:[%s3597_s9 + $0xa0] sm:$0xff] }
 0x341   : > { %1829 = vmatpush.msra.mxu1 %v1781_v43  ;;  %2611 = vmatpush.msra.mxu3 %v1781_v43  ;;  %v1756_v57 = vld [vmem:[%s3597_s9 + $0x18] sm:$0xff]  ;;  %v1755_v54 = vld [vmem:[%s3597_s9 + $0x10] sm:$0xff]  ;;  %v1754_v2 = vld [vmem:[%s3597_s9 + $0x8] sm:$0xff] }
 0x342   : > { %1789 = vmatpush.msra.mxu0 %v1764_v45  ;;  %2596 = vmatpush.msra.mxu2 %v1764_v45  ;;  %v1772_v35 = vld [vmem:[%s3597_s9 + $0x98] sm:$0xff]  ;;  %v1771_v60 = vld [vmem:[%s3597_s9 + $0x90] sm:$0xff]  ;;  %v1770_v59 = vld [vmem:[%s3597_s9 + $0x88] sm:$0xff] }
 0x343   : > { %1830 = vmatpush.msra.mxu1 %v1780_v21  ;;  %2612 = vmatpush.msra.mxu3 %v1780_v21  ;;  %v1753_v38 = vld [vmem:[%s3597_s9] sm:$0xff]  ;;  %v1915_v28 = vld [vmem:[%s3598_s10 + $0x8] sm:$0xff]  ;;  %v1916_v30 = vld [vmem:[%s3598_s10 + $0x10] sm:$0xff] }
 0x344   : > { %1790 = vmatpush.msra.mxu0 %v1763_v33  ;;  %2597 = vmatpush.msra.mxu2 %v1763_v33  ;;  %v1769_v62 = vld [vmem:[%s3597_s9 + $0x80] sm:$0xff]  ;;  %v1917_v39 = vld [vmem:[%s3598_s10 + $0x18] sm:$0xff] }
 0x345   : > { %1831 = vmatpush.msra.mxu1 %v1779_v47  ;;  %2613 = vmatpush.msra.mxu3 %v1779_v47  ;;  %v1867_v4 = vld [vmem:[%s3599_s11] sm:$0xf] }
 0x346   : > { %1791 = vmatpush.msra.mxu0 %v1762_v17  ;;  %2598 = vmatpush.msra.mxu2 %v1762_v17  ;;  %v1914_v29 = vld [vmem:[%s3598_s10] sm:$0xff] }
 0x347   : > { %1832 = vmatpush.msra.mxu1 %v1778_v44  ;;  %2614 = vmatpush.msra.mxu3 %v1778_v44 }
 0x348   : > { %1792 = vmatpush.msra.mxu0 %v1761_v49  ;;  %2599 = vmatpush.msra.mxu2 %v1761_v49 }
 0x349   : > { %1833 = vmatpush.msra.mxu1 %v1777_v51  ;;  %2615 = vmatpush.msra.mxu3 %v1777_v51 }
 0x34a   : > { %1793 = vmatpush.msra.mxu0 %v1760_v24  ;;  %2600 = vmatpush.msra.mxu2 %v1760_v24 }
 0x34b   : > { %1834 = vmatpush.msra.mxu1 %v1776_v25  ;;  %2616 = vmatpush.msra.mxu3 %v1776_v25 }
 0x34c   : > { %1794 = vmatpush.msra.mxu0 %v1759_v55  ;;  %2601 = vmatpush.msra.mxu2 %v1759_v55  ;;  %v1936_v55 = vld [vmem:[%s3600_s12] sm:$0x1] }
 0x34d   : > { %1835 = vmatpush.msra.mxu1 %v1775_v34  ;;  %2617 = vmatpush.msra.mxu3 %v1775_v34 }
 0x34e   : > { %1795 = vmatpush.msra.mxu0 %v1758_v12  ;;  %2602 = vmatpush.msra.mxu2 %v1758_v12 }
 0x34f   : > { %1836 = vmatpush.msra.mxu1 %v1774_v46  ;;  %2618 = vmatpush.msra.mxu3 %v1774_v46 }
 0x350   : > { %1796 = vmatpush.msra.mxu0 %v1757_v22  ;;  %2603 = vmatpush.msra.mxu2 %v1757_v22 }
 0x351   : > { %1837 = vmatpush.msra.mxu1 %v1773_v52  ;;  %2619 = vmatpush.msra.mxu3 %v1773_v52 }
 0x352   : > { %1797 = vmatpush.msra.mxu0 %v1756_v57  ;;  %2604 = vmatpush.msra.mxu2 %v1756_v57 }
 0x353   : > { %1838 = vmatpush.msra.mxu1 %v1772_v35  ;;  %2620 = vmatpush.msra.mxu3 %v1772_v35 }
 0x354   : > { %1798 = vmatpush.msra.mxu0 %v1755_v54  ;;  %2605 = vmatpush.msra.mxu2 %v1755_v54 }
 0x355   : > { %1839 = vmatpush.msra.mxu1 %v1771_v60  ;;  %2621 = vmatpush.msra.mxu3 %v1771_v60 }
 0x356   : > { %1799 = vmatpush.msra.mxu0 %v1754_v2  ;;  %2606 = vmatpush.msra.mxu2 %v1754_v2 }
 0x357   : > { %1840 = vmatpush.msra.mxu1 %v1770_v59  ;;  %2622 = vmatpush.msra.mxu3 %v1770_v59 }
 0x358   : > { %1800 = vmatpush.msra.mxu0 %v1753_v38  ;;  %2607 = vmatpush.msra.mxu2 %v1753_v38 }
 0x359   : > { %1841 = vmatpush.msra.mxu1 %v1769_v62  ;;  %1801 = vmatmul.f32.vlgmr.msra.gmra.mxu0 %v3358_v58 }
 0x35a   : > { %1842 = vmatmul.f32.vlgmr.msra.gmra.mxu1 %v3363_v8  ;;  %2623 = vmatpush.msra.mxu3 %v1769_v62 }
 0x35b   : > { %1819 = vmatmul.f32.vlgmr.msra.gmra.mxu2 %v3406_v10  ;;  %1860 = vmatmul.f32.vlgmr.msra.gmra.mxu3 %v3411_v16 }
 0x35c   : > { %2503 = vmatpush.msk.msrb.mxu2 %vm1881_vm11, %v1867_v4  ;;  %2508 = vmatpush.msk.msrb.mxu3 %vm1881_vm11, %v1867_v4 }
 0x361   : > { %1804 = vmatmul.f32.gmra.mxu0 %v3366_v11 }
 0x362   : > { %1845 = vmatmul.f32.gmra.mxu1 %v3371_v9 }
 0x363   : > { %1822 = vmatmul.f32.gmra.mxu2 %v3414_v36  ;;  %1863 = vmatmul.f32.gmra.mxu3 %v3418_v5 }
 0x369   : > { %1807 = vmatmul.f32.gmra.mxu0 %v3374_v19 }
 0x36a   : > { %1848 = vmatmul.f32.gmra.mxu1 %v3379_v32 }
 0x371   : > { %1810 = vmatmul.f32.gmra.mxu0 %v3382_v41 }
 0x372   : > { %1851 = vmatmul.f32.gmra.mxu1 %v3387_v48 }
 0x379   : > { %1813 = vmatmul.f32.gmra.mxu0 %v3390_v50 }
 0x37a   : > { %1854 = vmatmul.f32.gmra.mxu1 %v3395_v6 }
 0x381   : > { %1816 = vmatmul.f32.gmra.mxu0 %v3398_v53 }
 0x382   : > { %1857 = vmatmul.f32.gmra.mxu1 %v3403_v7 }
 0x3d6   : > { %v1802_v58 = vpop.f32.mrf.mxu0 }
 0x3d7   : > { %v1843_v8 = vpop.f32.mrf.mxu1 }
 0x3d8   : > { %v1844_v11 = vadd.f32 %v1843_v8, %v1802_v58 }
 0x3da   : > { %2504 = vmatmul.msk.f32.vlgmr.msrb.gmra.mxu2 %vm1868_vm12, %v1844_v11 }
 0x3de   : > { %v1805_v9 = vpop.f32.mrf.mxu0  ;;  %v1820_v14 = vpop.f32.mrf.mxu2 }
 0x3df   : > { %v1846_v19 = vpop.f32.mrf.mxu1  ;;  %v1861_v27 = vpop.f32.mrf.mxu3 }
 0x3e0   : > { %v1847_v32 = vadd.f32 %v1846_v19, %v1805_v9  ;;  %v1862_v15 = vadd.f32 %v1861_v27, %v1820_v14 }
 0x3e2   : > { %2505 = vmatmul.msk.f32.gmra.mxu2 %vm1868_vm12, %v1847_v32 }
 0x3e6   : > { %v1808_v41 = vpop.f32.mrf.mxu0  ;;  %v1823_v16 = vpop.f32.mrf.mxu2 }
 0x3e7   : > { %v1849_v48 = vpop.f32.mrf.mxu1  ;;  %v1864_v3 = vpop.f32.mrf.mxu3 }
 0x3e8   : > { %v1850_v50 = vadd.f32 %v1849_v48, %v1808_v41  ;;  %v1865_v18 = vadd.f32 %v1864_v3, %v1823_v16 }
 0x3ea   : > { %2506 = vmatmul.msk.f32.gmra.mxu2 %vm1868_vm12, %v1850_v50 }
 0x3ee   : > { %v1811_v6 = vpop.f32.mrf.mxu0 }
 0x3ef   : > { %v1852_v53 = vpop.f32.mrf.mxu1 }
 0x3f0   : > { %v1853_v63 = vadd.f32 %v1852_v53, %v1811_v6 }
 0x3f2   : > { %2507 = vmatmul.msk.f32.gmra.mxu2 %vm1868_vm12, %v1853_v63 }
 0x3f6   : > { %v1814_v7 = vpop.f32.mrf.mxu0 }
 0x3f7   : > { %v1855_v10 = vpop.f32.mrf.mxu1 }
 0x3f8   : > { %v1856_v1 = vadd.f32 %v1855_v10, %v1814_v7 }
 0x3fa   : > { %2509 = vmatmul.msk.f32.vlgmr.msrb.gmra.mxu3 %vm1868_vm12, %v1856_v1 }
 0x3fe   : > { %v1817_v13 = vpop.f32.mrf.mxu0 }
 0x3ff   : > { %v1858_v26 = vpop.f32.mrf.mxu1 }
 0x400   : > { %v1859_v61 = vadd.f32 %v1858_v26, %v1817_v13 }
 0x402   : > { %2510 = vmatmul.msk.f32.gmra.mxu3 %vm1868_vm12, %v1859_v61 }
 0x40a   : > { %2511 = vmatmul.msk.f32.gmra.mxu3 %vm1868_vm12, %v1862_v15 }
 0x412   : > { %2512 = vmatmul.msk.f32.gmra.mxu3 %vm1868_vm12, %v1865_v18 }
 0x45d   : > { %v1902_v20 = vpop.f32.mrf.mxu2 }
 0x45e   : > { %v1918_v31 = vmul.f32 %v1914_v29, %v1902_v20 }
 0x460   : > { %v1923_v0 = vsel %vm1922_vm13, %v1918_v31, 0.0 }
 0x465   : > { %v1905_v36 = vpop.f32.mrf.mxu2 }
 0x466   : > { %v1919_v5 = vmul.f32 %v1915_v28, %v1905_v36 }
 0x468   : > { %v1924_v56 = vsel %vm1922_vm13, %v1919_v5, 0.0 }
 0x469   : > { %v1925_v23 = vadd.f32 %v1924_v56, %v1923_v0 }
 0x46d   : > { %v1908_v37 = vpop.f32.mrf.mxu2 }
 0x46e   : > { %v1920_v40 = vmul.f32 %v1916_v30, %v1908_v37 }
 0x470   : > { %v1926_v42 = vsel %vm1922_vm13, %v1920_v40, 0.0 }
 0x471   : > { %v1927_v21 = vadd.f32 %v1926_v42, %v1925_v23 }
 0x475   : > { %v1911_v43 = vpop.f32.mrf.mxu2 }
 0x476   : > { %v1921_v45 = vmul.f32 %v1917_v39, %v1911_v43 }
 0x478   : > { %v1928_v33 = vsel %vm1922_vm13, %v1921_v45, 0.0 }
 0x479   : > { %v1929_v47 = vadd.f32 %v1928_v33, %v1927_v21 }
 0x47b   : > { %v1930_v17 = vrot.slane %v1929_v47, 4 }
 0x47d   : > { %v1931_v44 = vadd.f32 %v1930_v17, %v1929_v47  ;;  %v1994_v49 = vpop.f32.mrf.mxu3 }
 0x47e   : > { %v2006_v52 = vmul.f32 %v1994_v49, %v1914_v29 }
 0x47f   : > { %v1932_v51 = vrot.slane %v1931_v44, 2 }
 0x480   : > { %v2010_v60 = vsel %vm1922_vm13, %v2006_v52, 0.0 }
 0x481   : > { %v1933_v24 = vadd.f32 %v1932_v51, %v1931_v44 }
 0x483   : > { %v1934_v25 = vrot.slane %v1933_v24, 1 }
 0x485   : > { %v1997_v34 = vpop.f32.mrf.mxu3  ;;  %v1935_v12 = vadd.f32 %v1934_v25, %v1933_v24 }
 0x486   : > { %v2007_v57 = vmul.f32 %v1997_v34, %v1915_v28 }
 0x487   : > { %v3564_v46 = vadd.f32 %v1936_v55, %v1935_v12 }
 0x488   : > { %v2011_v2 = vsel %vm1922_vm13, %v2007_v57, 0.0 }
 0x489   : > { %v1938_v22 = vmul.f32 %v3564_v46, %v3564_v46  ;;  %v2012_v38 = vadd.f32 %v2011_v2, %v2010_v60 }
 0x48b   : > { %v1940_v35 = vsel %vm1939_vm14, %v1938_v22, 0.0 }
 0x48c   : > { %1941 = vadd.xlane.f32.xlu0 %v1940_v35 }
 0x48d   : > { %v2000_v54 = vpop.f32.mrf.mxu3 }
 0x48e   : > { %v2008_v59 = vmul.f32 %v2000_v54, %v1916_v30 }
 0x490   : > { %v2013_v62 = vsel %vm1922_vm13, %v2008_v59, 0.0 }
 0x491   : > { %v2014_v4 = vadd.f32 %v2013_v62, %v2012_v38 }
 0x495   : > { %v2003_v58 = vpop.f32.mrf.mxu3 }
 0x496   : > { %v2009_v8 = vmul.f32 %v2003_v58, %v1917_v39 }
 0x498   : > { %v2015_v11 = vsel %vm1922_vm13, %v2009_v8, 0.0 }
 0x499   : > { %v2016_v9 = vadd.f32 %v2015_v11, %v2014_v4 }
 0x49b   : > { %v2017_v19 = vrot.slane %v2016_v9, 4 }
 0x49d   : > { %v2018_v32 = vadd.f32 %v2017_v19, %v2016_v9 }
 0x49f   : > { %v2019_v41 = vrot.slane %v2018_v32, 2 }
 0x4a1   : > { %v2020_v48 = vadd.f32 %v2019_v41, %v2018_v32 }
 0x4a3   : > { %v2021_v50 = vrot.slane %v2020_v48, 1 }
 0x4a5   : > { %v2022_v6 = vadd.f32 %v2021_v50, %v2020_v48 }
 0x4a7   : > { %v2023_v53 = vadd.f32 %v2022_v6, %v1936_v55 }
 0x4a9   : > { %v2024_v63 = vmul.f32 %v2023_v53, %v2023_v53 }
 0x4ab   : > { %v2025_v7 = vsel %vm1939_vm14, %v2024_v63, 0.0 }
 0x4ac   : > { %2026 = vadd.xlane.f32.xlu0 %v2025_v7 }
 0x4ff   : > { %v1942_v10 = vpop.xlane.xlu0 %1941 }
 0x500   : > { %v1943_v1 = vrot.slane %v1942_v10, 4 }
 0x502   : > { %v1944_v13 = vadd.f32 %v1943_v1, %v1942_v10 }
 0x504   : > { %v1945_v26 = vrot.slane %v1944_v13, 2 }
 0x506   : > { %v1946_v61 = vadd.f32 %v1945_v26, %v1944_v13 }
 0x508   : > { %v1947_v14 = vrot.slane %v1946_v61, 1 }
 0x50a   : > { %v1948_v27 = vadd.f32 %v1947_v14, %v1946_v61 }
 0x50c   : > { %2624 = vpush %v1948_v27 }
 0x51f   : > { %v2027_v15 = vpop.xlane.xlu0 %2026 }
 0x520   : > { %v2028_v16 = vrot.slane %v2027_v15, 4 }
 0x522   : > { %v2029_v18 = vadd.f32 %v2028_v16, %v2027_v15 }
 0x524   : > { %v2030_v20 = vrot.slane %v2029_v18, 2 }
 0x526   : > { %v2031_v29 = vadd.f32 %v2030_v20, %v2029_v18 }
 0x528   : > { %v2032_v31 = vrot.slane %v2031_v29, 1 }
 0x52a   : > { %v2033_v39 = vadd.f32 %v2032_v31, %v2031_v29 }
 0x53d   : > { %s2625_s15 = spop %2624 }
 0x53e   : > { %s1950_s18 = smax.f32 %s2726_s16, %s2625_s15 }
 0x53f   : > { %v1951_v3 = vstv %s1950_s18 }
 0x540   : > { %2696 = vrsqrt.f32 %v1951_v3  ;;  %vm1958_vm0 = vweird.f32 %v1951_v3 }
 0x546   : > { %v2697_v36 = vpop.eup %2696 }
 0x547   : > { %v1953_v28 = vmul.f32 %v2697_v36, %v1951_v3  ;;  %vm1959_vm15 = vweird.f32 %v2697_v36 }
 0x548   : > { %vm1960_vm1 = vmor %vm1958_vm0, %vm1959_vm15 }
 0x549   : > { %v1954_v37 = vmul.f32 %v2697_v36, %v1953_v28 }
 0x54b   : > { %v1955_v30 = vmul.f32 0.5, %v1954_v37 }
 0x54d   : > { %v1956_v5 = vsub.f32 1.5, %v1955_v30 }
 0x54f   : > { %v1957_v40 = vmul.f32 %v2697_v36, %v1956_v5 }
 0x551   : > { %v1961_v56 = vsel %vm1960_vm1, %v2697_v36, %v1957_v40 }
 0x552   : > { %2626 = vpush %v1961_v56 }
 0x553   : > { %2628 = vpush %v2033_v39 }
 0x583   : > { %s2627_s23 = spop %2626 }
 0x584   : > { %s2629_s25 = spop %2628  ;;  %v1963_v49 = vstv %s2627_s23 }
 0x585   : > { %s2035_s17 = smax.f32 %s2726_s16, %s2629_s25  ;;  %v1964_v51 = vmul.f32 %v1963_v49, %v3564_v46 }
 0x586   : > { %v2036_v0 = vstv %s2035_s17 }
 0x587   : > { %2698 = vrsqrt.f32 %v2036_v0  ;;  %vm2043_vm3 = vweird.f32 %v2036_v0 }
 0x58d   : > { %v2699_v42 = vpop.eup %2698 }
 0x58e   : > { %v2038_v23 = vmul.f32 %v2699_v42, %v2036_v0  ;;  %vm2044_vm2 = vweird.f32 %v2699_v42 }
 0x58f   : > { %vm2045_vm4 = vmor %vm2043_vm3, %vm2044_vm2 }
 0x590   : > { %v2039_v43 = vmul.f32 %v2699_v42, %v2038_v23 }
 0x592   : > { %v2040_v45 = vmul.f32 0.5, %v2039_v43 }
 0x594   : > { %v2041_v21 = vsub.f32 1.5, %v2040_v45 }
 0x596   : > { %v2042_v33 = vmul.f32 %v2699_v42, %v2041_v21 }
 0x598   : > { %v2046_v47 = vsel %vm2045_vm4, %v2699_v42, %v2042_v33 }
 0x599   : > { %2630 = vpush %v2046_v47 }
 0x5ca   : > { %s2631_s19 = spop %2630 }
 0x5cb   : > { %v2048_v17 = vstv %s2631_s19 }
 0x5cc   : > { %v2049_v44 = vmul.f32 %v2048_v17, %v2023_v53 }
 0x5ce   : > { %2051 = vrot.lane.b32.xlu1 %v2049_v44, %s2727_s21 }
 0x640   : > { %v2052_v24 = vpop.permute.xlu1 %2051 }
 0x641   : > { %v2054_v25 = vsel %vm1922_vm13, %v1964_v51, %v2052_v24 }
 0x642   : > { %2055 = vst [vmem:[%s3614_s13] sm:$0x1] %v2054_v25 }
 0x643 PF: > { %s3615_s26 = sld [smem:[#allocation4_spill]] }
 0x644   : > { %s3616_s25 = sld [smem:[#allocation3_spill]] }
 0x649   : > { %s23_s27 = sadd.s32 1, %s3615_s26   ;;  %s3617_s26 = sld [smem:[#allocation5_spill]] }
 0x64a   : > { %p20_p7 = scmp.ge.s32.totalorder %s23_s27, 4  }
 0x64c   :  { %22 = sbr.rel (!%p20_p7) target bundleno = 2 (0x2), region = 128 }

</bundles_post_ra>
